<compile_context>
chip_gen: v6e
topology: v6e:2x2x1
jax: 0.10.0
libtpu: 0.0.40
codegen_flags: <defaults>
</compile_context>

<pallas_src>
import functools

import jax
import jax.numpy as jnp
from jax.experimental import pallas as pl
from jax.experimental.pallas import tpu as pltpu


_VMEM_LIMIT = 32 * 1024 * 1024
_LN_EPS = 1e-5


def _pick_tile(dim, target, align):
    """Largest tile <= target that divides dim and is a multiple of align,
    falling back to the full dim (always legal per the (8,128) rule)."""
    if dim <= target:
        return dim
    t = (target // align) * align
    while t >= align:
        if dim % t == 0:
            return t
        t -= align
    return dim


# ----------------------------------------------------------------------------
# Kernel 1: tiled matmul + bias (used for the fused QKV projection)
# ----------------------------------------------------------------------------

def _matmul_bias_kernel(x_ref, w_ref, b_ref, o_ref, acc_ref):
    @pl.when(pl.program_id(2) == 0)
    def _():
        acc_ref[...] = jnp.zeros_like(acc_ref)

    acc_ref[...] += jnp.dot(x_ref[...], w_ref[...],
                            preferred_element_type=jnp.float32)

    @pl.when(pl.program_id(2) == pl.num_programs(2) - 1)
    def _():
        o_ref[...] = (acc_ref[...] + b_ref[...].astype(jnp.float32)
                      ).astype(o_ref.dtype)


def linear_bias(x, w, b, *, tm=256, tn=512, tk=512):
    """(M, K) @ (K, N) + (1, N) -> (M, N), bf16 in / bf16 out, f32 accumulate."""
    M, K = x.shape
    N = w.shape[1]
    tm = _pick_tile(M, tm, 8)
    tn = _pick_tile(N, tn, 128)
    tk = _pick_tile(K, tk, 128)
    grid = (M // tm, N // tn, K // tk)
    return pl.pallas_call(
        _matmul_bias_kernel,
        out_shape=jax.ShapeDtypeStruct((M, N), x.dtype),
        grid_spec=pltpu.PrefetchScalarGridSpec(
            num_scalar_prefetch=0,
            grid=grid,
            in_specs=[
                pl.BlockSpec((tm, tk), lambda i, j, k: (i, k)),
                pl.BlockSpec((tk, tn), lambda i, j, k: (k, j)),
                pl.BlockSpec((1, tn), lambda i, j, k: (0, j)),
            ],
            out_specs=pl.BlockSpec((tm, tn), lambda i, j, k: (i, j)),
            scratch_shapes=[pltpu.VMEM((tm, tn), jnp.float32)]),
        compiler_params=pltpu.CompilerParams(
            dimension_semantics=("parallel", "parallel", "arbitrary"),
            vmem_limit_bytes=_VMEM_LIMIT),
    )(x, w, b)


# ----------------------------------------------------------------------------
# Kernel 2: tiled matmul + bias + residual + LayerNorm epilogue (Wo projection)
# ----------------------------------------------------------------------------

def _matmul_res_ln_kernel(x_ref, w_ref, b_ref, r_ref, g_ref, bb_ref,
                          o_ref, acc_ref, *, eps):
    @pl.when(pl.program_id(1) == 0)
    def _():
        acc_ref[...] = jnp.zeros_like(acc_ref)

    acc_ref[...] += jnp.dot(x_ref[...], w_ref[...],
                            preferred_element_type=jnp.float32)

    @pl.when(pl.program_id(1) == pl.num_programs(1) - 1)
    def _():
        y = (acc_ref[...] + b_ref[...].astype(jnp.float32)
             + r_ref[...].astype(jnp.float32))
        mu = jnp.mean(y, axis=-1, keepdims=True)
        var = jnp.mean((y - mu) * (y - mu), axis=-1, keepdims=True)
        yn = (y - mu) * jax.lax.rsqrt(var + eps)
        o_ref[...] = (yn * g_ref[...].astype(jnp.float32)
                      + bb_ref[...].astype(jnp.float32)).astype(o_ref.dtype)


def linear_residual_ln(x, w, b, residual, gamma, beta, *, tm=256, tk=512,
                       eps=_LN_EPS):
    """LayerNorm(x @ w + b + residual). N is kept whole (LN needs full rows)."""
    M, K = x.shape
    N = w.shape[1]
    tm = _pick_tile(M, tm, 8)
    tk = _pick_tile(K, tk, 128)
    grid = (M // tm, K // tk)
    kern = functools.partial(_matmul_res_ln_kernel, eps=eps)
    return pl.pallas_call(
        kern,
        out_shape=jax.ShapeDtypeStruct((M, N), x.dtype),
        grid_spec=pltpu.PrefetchScalarGridSpec(
            num_scalar_prefetch=0,
            grid=grid,
            in_specs=[
                pl.BlockSpec((tm, tk), lambda i, k: (i, k)),
                pl.BlockSpec((tk, N), lambda i, k: (k, 0)),
                pl.BlockSpec((1, N), lambda i, k: (0, 0)),
                pl.BlockSpec((tm, N), lambda i, k: (i, 0)),
                pl.BlockSpec((1, N), lambda i, k: (0, 0)),
                pl.BlockSpec((1, N), lambda i, k: (0, 0)),
            ],
            out_specs=pl.BlockSpec((tm, N), lambda i, k: (i, 0)),
            scratch_shapes=[pltpu.VMEM((tm, N), jnp.float32)]),
        compiler_params=pltpu.CompilerParams(
            dimension_semantics=("parallel", "arbitrary"),
            vmem_limit_bytes=_VMEM_LIMIT),
    )(x, w, b, residual, gamma, beta)


# ----------------------------------------------------------------------------
# Kernel 3: fused FFN (linear -> ReLU -> linear) + residual + LayerNorm,
#           tiled over the hidden dim as the reduction axis.
# ----------------------------------------------------------------------------

def _ffn_res_ln_kernel(x_ref, w1_ref, b1_ref, w2_ref, b2_ref, r_ref, g_ref,
                       bb_ref, o_ref, acc_ref, *, eps):
    @pl.when(pl.program_id(1) == 0)
    def _():
        acc_ref[...] = jnp.zeros_like(acc_ref)

    h = jnp.dot(x_ref[...], w1_ref[...], preferred_element_type=jnp.float32)
    h = jnp.maximum(h + b1_ref[...].astype(jnp.float32), 0.0)
    acc_ref[...] += jnp.dot(h.astype(x_ref.dtype), w2_ref[...],
                            preferred_element_type=jnp.float32)

    @pl.when(pl.program_id(1) == pl.num_programs(1) - 1)
    def _():
        y = (acc_ref[...] + b2_ref[...].astype(jnp.float32)
             + r_ref[...].astype(jnp.float32))
        mu = jnp.mean(y, axis=-1, keepdims=True)
        var = jnp.mean((y - mu) * (y - mu), axis=-1, keepdims=True)
        yn = (y - mu) * jax.lax.rsqrt(var + eps)
        o_ref[...] = (yn * g_ref[...].astype(jnp.float32)
                      + bb_ref[...].astype(jnp.float32)).astype(o_ref.dtype)


def ffn_residual_ln(x, w1, b1, w2, b2, residual, gamma, beta, *, tm=256,
                    th=512, eps=_LN_EPS):
    """LayerNorm(relu(x@w1+b1)@w2 + b2 + residual), hidden dim tiled (ReLU is
    per-hidden-unit so per-tile partial products are exact)."""
    M, D = x.shape
    Hf = w1.shape[1]
    tm = _pick_tile(M, tm, 8)
    th = _pick_tile(Hf, th, 128)
    grid = (M // tm, Hf // th)
    kern = functools.partial(_ffn_res_ln_kernel, eps=eps)
    return pl.pallas_call(
        kern,
        out_shape=jax.ShapeDtypeStruct((M, D), x.dtype),
        grid_spec=pltpu.PrefetchScalarGridSpec(
            num_scalar_prefetch=0,
            grid=grid,
            in_specs=[
                pl.BlockSpec((tm, D), lambda i, h: (i, 0)),
                pl.BlockSpec((D, th), lambda i, h: (0, h)),
                pl.BlockSpec((1, th), lambda i, h: (0, h)),
                pl.BlockSpec((th, D), lambda i, h: (h, 0)),
                pl.BlockSpec((1, D), lambda i, h: (0, 0)),
                pl.BlockSpec((tm, D), lambda i, h: (i, 0)),
                pl.BlockSpec((1, D), lambda i, h: (0, 0)),
                pl.BlockSpec((1, D), lambda i, h: (0, 0)),
            ],
            out_specs=pl.BlockSpec((tm, D), lambda i, h: (i, 0)),
            scratch_shapes=[pltpu.VMEM((tm, D), jnp.float32)]),
        compiler_params=pltpu.CompilerParams(
            dimension_semantics=("parallel", "arbitrary"),
            vmem_limit_bytes=_VMEM_LIMIT),
    )(x, w1, b1, w2, b2, residual, gamma, beta)


# ----------------------------------------------------------------------------
# Kernel 4: multi-head self-attention, all heads of one batch per grid step.
#   Static per-head loop of 2-D MXU dots (no XLU transposes); output written
#   as a lane-contiguous (S, D) slab.
# ----------------------------------------------------------------------------

def _attention_kernel(qkv_ref, o_ref, *, n_head, d_head, scale):
    qkv = qkv_ref[0]                                     # (S, 3*D) bf16
    D = n_head * d_head
    for h in range(n_head):                              # static unroll
        oq = h * d_head
        q = qkv[:, oq:oq + d_head]                       # (S, dk)
        k = qkv[:, D + oq:D + oq + d_head]               # (S, dk)
        v = qkv[:, 2 * D + oq:2 * D + oq + d_head]       # (S, dk)

        # scores: contract dk directly (no materialized k.T), f32 accumulate,
        # scale in f32 (more accurate than scaling bf16 Q).
        s = jax.lax.dot_general(
            q, k, (((1,), (1,)), ((), ())),
            preferred_element_type=jnp.float32) * scale  # (S, S)
        s = s - jnp.max(s, axis=-1, keepdims=True)
        p = jnp.exp(s)
        p = p * pl.reciprocal(jnp.sum(p, axis=-1, keepdims=True), approx=True)

        o = jnp.dot(p.astype(v.dtype), v,
                    preferred_element_type=jnp.float32)  # (S, dk)
        o_ref[0, :, oq:oq + d_head] = o.astype(o_ref.dtype)


def attention(qkv, batch, seq, n_head, d_head, scale):
    """qkv: (B*S, 3*D) fused projection output -> (B*S, D) attention output.

    Column order of the fused QKV weight is [q|k|v] x [head] x [dk], so head
    split/merge is pure static slicing inside the kernel; the host-side
    reshapes are free (contiguous).
    """
    D = n_head * d_head
    qkv3 = qkv.reshape(batch, seq, 3 * D)
    kern = functools.partial(_attention_kernel, n_head=n_head, d_head=d_head,
                             scale=scale)
    out = pl.pallas_call(
        kern,
        out_shape=jax.ShapeDtypeStruct((batch, seq, D), qkv.dtype),
        grid_spec=pltpu.PrefetchScalarGridSpec(
            num_scalar_prefetch=0,
            grid=(batch,),
            in_specs=[pl.BlockSpec((1, seq, 3 * D), lambda b: (b, 0, 0))],
            out_specs=pl.BlockSpec((1, seq, D), lambda b: (b, 0, 0))),
        compiler_params=pltpu.CompilerParams(
            dimension_semantics=("parallel",),
            vmem_limit_bytes=_VMEM_LIMIT),
    )(qkv3)
    return out.reshape(batch * seq, D)


# ----------------------------------------------------------------------------
# Parameters (deterministic, synthetic), stored in bf16
# ----------------------------------------------------------------------------

def init_params(key, d_model, n_head, ffn_hidden, n_layers, dtype=jnp.bfloat16):
    del n_head  # head count is a runtime-static arg to the forward pass
    layers = []
    s = 0.02
    for _ in range(n_layers):
        key, k0, k1, k2, k3 = jax.random.split(key, 5)
        lp = {
            "wqkv": (jax.random.normal(k0, (d_model, 3 * d_model), jnp.float32)
                     * s).astype(dtype),
            "bqkv": jnp.zeros((1, 3 * d_model), dtype),
            "wo": (jax.random.normal(k1, (d_model, d_model), jnp.float32)
                   * s).astype(dtype),
            "bo": jnp.zeros((1, d_model), dtype),
            "ln1_g": jnp.ones((1, d_model), dtype),
            "ln1_b": jnp.zeros((1, d_model), dtype),
            "w1": (jax.random.normal(k2, (d_model, ffn_hidden), jnp.float32)
                   * s).astype(dtype),
            "b1": jnp.zeros((1, ffn_hidden), dtype),
            "w2": (jax.random.normal(k3, (ffn_hidden, d_model), jnp.float32)
                   * s).astype(dtype),
            "b2": jnp.zeros((1, d_model), dtype),
            "ln2_g": jnp.ones((1, d_model), dtype),
            "ln2_b": jnp.zeros((1, d_model), dtype),
        }
        layers.append(lp)
    return layers


# ----------------------------------------------------------------------------
# Forward pass (4 Pallas calls per layer)
# ----------------------------------------------------------------------------

@functools.partial(jax.jit, static_argnames=("n_head",))
def transformer_forward(src, layers, *, n_head):
    B, S, D = src.shape
    dk = D // n_head
    scale = 1.0 / (dk ** 0.5)

    x = src.astype(jnp.bfloat16).reshape(B * S, D)
    for lp in layers:
        qkv = linear_bias(x, lp["wqkv"], lp["bqkv"])                  # (M, 3D)
        a = attention(qkv, B, S, n_head, dk, scale)                   # (M, D)
        # dropout(drop_prob) is identity in eval mode
        x = linear_residual_ln(a, lp["wo"], lp["bo"], x,
                               lp["ln1_g"], lp["ln1_b"])              # (M, D)
        x = ffn_residual_ln(x, lp["w1"], lp["b1"], lp["w2"], lp["b2"],
                            x, lp["ln2_g"], lp["ln2_b"])              # (M, D)
    return x.reshape(B, S, D)


# ----------------------------------------------------------------------------
# Pure-JAX reference (f32) for a correctness cross-check
# ----------------------------------------------------------------------------

def _ln_ref(y, g, b, eps=_LN_EPS):
    mu = jnp.mean(y, axis=-1, keepdims=True)
    var = jnp.mean((y - mu) * (y - mu), axis=-1, keepdims=True)
    return ((y - mu) * jax.lax.rsqrt(var + eps) * g.astype(jnp.float32)
            + b.astype(jnp.float32))


def reference_forward(src, layers, n_head):
    B, S, D = src.shape
    dk = D // n_head
    x = src.astype(jnp.float32).reshape(B * S, D)
    for lp in layers:
        qkv = x @ lp["wqkv"].astype(jnp.float32) + lp["bqkv"].astype(jnp.float32)
        qkv = qkv.reshape(B, S, 3, n_head, dk)
        q = qkv[:, :, 0].transpose(0, 2, 1, 3)
        k = qkv[:, :, 1].transpose(0, 2, 1, 3)
        v = qkv[:, :, 2].transpose(0, 2, 1, 3)
        s = jnp.einsum("bhqd,bhkd->bhqk", q, k) / (dk ** 0.5)
        p = jax.nn.softmax(s, axis=-1)
        a = jnp.einsum("bhqk,bhkd->bhqd", p, v).transpose(0, 2, 1, 3)
        a = a.reshape(B * S, D)
        x = _ln_ref(a @ lp["wo"].astype(jnp.float32)
                    + lp["bo"].astype(jnp.float32) + x,
                    lp["ln1_g"], lp["ln1_b"])
        h = jnp.maximum(x @ lp["w1"].astype(jnp.float32)
                        + lp["b1"].astype(jnp.float32), 0.0)
        f = h @ lp["w2"].astype(jnp.float32) + lp["b2"].astype(jnp.float32)
        x = _ln_ref(f + x, lp["ln2_g"], lp["ln2_b"])
    return x.reshape(B, S, D)


if __name__ == "__main__":
    # Small config consistent with Transformer(d_model, n_head, ffn_hidden,
    # n_layers, drop_prob, args, eAtt_d)
    d_model, n_head, ffn_hidden, n_layers = 32, 4, 64, 2
    batch, seq = 2, 8

    key = jax.random.PRNGKey(0)
    k_param, k_src = jax.random.split(key)
    layers = init_params(k_param, d_model, n_head, ffn_hidden, n_layers)
    src = jax.random.normal(k_src, (batch, seq, d_model), jnp.float32)

    out = transformer_forward(src, layers, n_head=n_head)
    out = jax.block_until_ready(out)

    assert out.shape == (batch, seq, d_model)
    out_f32 = out.astype(jnp.float32)
    assert bool(jnp.all(jnp.isfinite(out_f32)))

    ref = reference_forward(src, layers, n_head)
    assert bool(jnp.allclose(out_f32, ref, atol=2e-1, rtol=2e-1))

    print("KERNEL_OK")
</pallas_src>

<mosaic_0001>
module attributes {stable_mosaic.version = 11 : i64} {
  func.func @_matmul_bias_kernel(%arg0: i32, %arg1: i32, %arg2: i32, %arg3: memref<16x32xbf16, #tpu.memory_space<vmem>>, %arg4: memref<32x96xbf16, #tpu.memory_space<vmem>>, %arg5: memref<1x96xbf16, #tpu.memory_space<vmem>>, %arg6: memref<16x96xbf16, #tpu.memory_space<vmem>>, %arg7: memref<16x96xf32, #tpu.memory_space<vmem>>) attributes {dimension_semantics = [#tpu.dimension_semantics<parallel>, #tpu.dimension_semantics<parallel>, #tpu.dimension_semantics<arbitrary>], iteration_bounds = array<i64: 1, 1, 1>, scalar_prefetch = 0 : i64, scratch_operands = 1 : i64, tpu.core_type = #tpu.core_type<tc>, window_params = [{transform_indices = @transform_0, window_bounds = array<i64: 16, 32>}, {transform_indices = @transform_1, window_bounds = array<i64: 32, 96>}, {transform_indices = @transform_2, window_bounds = array<i64: 1, 96>}, {transform_indices = @transform_3, window_bounds = array<i64: 16, 96>}]} {
    %c0_i32 = arith.constant 0 : i32
    %0 = arith.cmpi eq, %arg2, %c0_i32 : i32
    %1 = arith.extui %0 : i1 to i32
    %c0_i32_0 = arith.constant 0 : i32
    %2 = arith.cmpi ne, %1, %c0_i32_0 : i32
    scf.if %2 {
      %cst_10 = arith.constant 0.000000e+00 : f32
      %12 = vector.broadcast %cst_10 : f32 to vector<16x96xf32>
      %c0_11 = arith.constant 0 : index
      %c0_12 = arith.constant 0 : index
      %13 = vector.load %arg7[%c0_11, %c0_12] : memref<16x96xf32, #tpu.memory_space<vmem>>, vector<16x96xf32>
      tpu.vector_store %arg7[%c0_11, %c0_12], %12 {strides = array<i32>} : memref<16x96xf32, #tpu.memory_space<vmem>>, vector<16x96xf32>,
    } else {
    }
    %c0 = arith.constant 0 : index
    %c0_1 = arith.constant 0 : index
    %3 = vector.load %arg7[%c0, %c0_1] : memref<16x96xf32, #tpu.memory_space<vmem>>, vector<16x96xf32>
    %c0_2 = arith.constant 0 : index
    %c0_3 = arith.constant 0 : index
    %4 = vector.load %arg3[%c0_2, %c0_3] : memref<16x32xbf16, #tpu.memory_space<vmem>>, vector<16x32xbf16>
    %c0_4 = arith.constant 0 : index
    %c0_5 = arith.constant 0 : index
    %5 = vector.load %arg4[%c0_4, %c0_5] : memref<32x96xbf16, #tpu.memory_space<vmem>>, vector<32x96xbf16>
    %cst = arith.constant dense<0.000000e+00> : vector<16x96xf32>
    %6 = tpu.matmul %4, %5, %cst {dimension_numbers = #tpu.dot_dimension_numbers<[1], [0], [0], [1], [0, 0, 1, 1], [], []>} : vector<16x32xbf16>, vector<32x96xbf16>, vector<16x96xf32> -> vector<16x96xf32>
    %7 = arith.addf %3, %6 : vector<16x96xf32>
    %c0_6 = arith.constant 0 : index
    %c0_7 = arith.constant 0 : index
    %8 = vector.load %arg7[%c0_6, %c0_7] : memref<16x96xf32, #tpu.memory_space<vmem>>, vector<16x96xf32>
    tpu.vector_store %arg7[%c0_6, %c0_7], %7 {strides = array<i32>} : memref<16x96xf32, #tpu.memory_space<vmem>>, vector<16x96xf32>,
    %c0_i32_8 = arith.constant 0 : i32
    %9 = arith.cmpi eq, %arg2, %c0_i32_8 : i32
    %10 = arith.extui %9 : i1 to i32
    %c0_i32_9 = arith.constant 0 : i32
    %11 = arith.cmpi ne, %10, %c0_i32_9 : i32
    scf.if %11 {
      %c0_10 = arith.constant 0 : index
      %c0_11 = arith.constant 0 : index
      %12 = vector.load %arg7[%c0_10, %c0_11] : memref<16x96xf32, #tpu.memory_space<vmem>>, vector<16x96xf32>
      %c0_12 = arith.constant 0 : index
      %c0_13 = arith.constant 0 : index
      %13 = vector.load %arg5[%c0_12, %c0_13] : memref<1x96xbf16, #tpu.memory_space<vmem>>, vector<1x96xbf16>
      %14 = arith.extf %13 : vector<1x96xbf16> to vector<1x96xf32>
      %15 = vector.broadcast %14 : vector<1x96xf32> to vector<16x96xf32>
      %16 = arith.addf %12, %15 : vector<16x96xf32>
      %17 = arith.truncf %16 : vector<16x96xf32> to vector<16x96xbf16>
      %c0_14 = arith.constant 0 : index
      %c0_15 = arith.constant 0 : index
      %18 = vector.load %arg6[%c0_14, %c0_15] : memref<16x96xbf16, #tpu.memory_space<vmem>>, vector<16x96xbf16>
      tpu.vector_store %arg6[%c0_14, %c0_15], %17 {strides = array<i32>} : memref<16x96xbf16, #tpu.memory_space<vmem>>, vector<16x96xbf16>,
    } else {
    }
    return
  }
  func.func @transform_0(%arg0: i32, %arg1: i32, %arg2: i32) -> (i32, i32) {
    %c0_i32 = arith.constant 0 : i32
    return %arg0, %arg2 : i32, i32
  }
  func.func @transform_1(%arg0: i32, %arg1: i32, %arg2: i32) -> (i32, i32) {
    %c0_i32 = arith.constant 0 : i32
    return %arg2, %arg1 : i32, i32
  }
  func.func @transform_2(%arg0: i32, %arg1: i32, %arg2: i32) -> (i32, i32) {
    %c0_i32 = arith.constant 0 : i32
    %c0_i32_0 = arith.constant 0 : i32
    return %c0_i32, %arg1 : i32, i32
  }
  func.func @transform_3(%arg0: i32, %arg1: i32, %arg2: i32) -> (i32, i32) {
    %c0_i32 = arith.constant 0 : i32
    return %arg0, %arg1 : i32, i32
  }
}

module attributes {stable_mosaic.version = 11 : i64} {
  func.func @_attention_kernel(%arg0: i32, %arg1: memref<1x8x96xbf16, #tpu.memory_space<vmem>>, %arg2: memref<1x8x32xbf16, #tpu.memory_space<vmem>>) attributes {dimension_semantics = [#tpu.dimension_semantics<parallel>], iteration_bounds = array<i64: 2>, scalar_prefetch = 0 : i64, scratch_operands = 0 : i64, tpu.core_type = #tpu.core_type<tc>, window_params = [{transform_indices = @transform_0, window_bounds = array<i64: 1, 8, 96>}, {transform_indices = @transform_1, window_bounds = array<i64: 1, 8, 32>}]} {
    %c0 = arith.constant 0 : index
    %c0_0 = arith.constant 0 : index
    %c0_1 = arith.constant 0 : index
    %0 = vector.load %arg1[%c0, %c0_0, %c0_1] : memref<1x8x96xbf16, #tpu.memory_space<vmem>>, vector<1x8x96xbf16>
    %1 = vector.shape_cast %0 : vector<1x8x96xbf16> to vector<8x96xbf16>
    %2 = vector.extract_strided_slice %1 {offsets = [0, 0], sizes = [8, 8], strides = [1, 1]} : vector<8x96xbf16> to vector<8x8xbf16>
    %3 = vector.extract_strided_slice %1 {offsets = [0, 32], sizes = [8, 8], strides = [1, 1]} : vector<8x96xbf16> to vector<8x8xbf16>
    %4 = vector.extract_strided_slice %1 {offsets = [0, 64], sizes = [8, 8], strides = [1, 1]} : vector<8x96xbf16> to vector<8x8xbf16>
    %cst = arith.constant dense<0.000000e+00> : vector<8x8xf32>
    %5 = tpu.matmul %2, %3, %cst {dimension_numbers = #tpu.dot_dimension_numbers<[1], [1], [0], [0], [0, 0, 1, 0], [], []>} : vector<8x8xbf16>, vector<8x8xbf16>, vector<8x8xf32> -> vector<8x8xf32>
    %cst_2 = arith.constant 0.353553385 : f32
    %6 = vector.broadcast %cst_2 : f32 to vector<8x8xf32>
    %7 = arith.mulf %5, %6 : vector<8x8xf32>
    %cst_3 = arith.constant dense<0xFF800000> : vector<8xf32>
    %8 = vector.multi_reduction <maximumf>, %7, %cst_3 [1] : vector<8x8xf32> to vector<8xf32>
    %9 = vector.shape_cast %8 : vector<8xf32> to vector<8x1xf32>
    %10 = vector.broadcast %9 : vector<8x1xf32> to vector<8x8xf32>
    %11 = arith.subf %7, %10 : vector<8x8xf32>
    %12 = math.exp %11 : vector<8x8xf32>
    %cst_4 = arith.constant dense<0.000000e+00> : vector<8xf32>
    %13 = vector.multi_reduction <add>, %12, %cst_4 [1] : vector<8x8xf32> to vector<8xf32>
    %14 = vector.shape_cast %13 : vector<8xf32> to vector<8x1xf32>
    %15 = tpu.reciprocal %14 {approx = true} : vector<8x1xf32> -> vector<8x1xf32>
    %16 = vector.broadcast %15 : vector<8x1xf32> to vector<8x8xf32>
    %17 = arith.mulf %12, %16 : vector<8x8xf32>
    %18 = arith.truncf %17 : vector<8x8xf32> to vector<8x8xbf16>
    %cst_5 = arith.constant dense<0.000000e+00> : vector<8x8xf32>
    %19 = tpu.matmul %18, %4, %cst_5 {dimension_numbers = #tpu.dot_dimension_numbers<[1], [0], [0], [1], [0, 0, 1, 1], [], []>} : vector<8x8xbf16>, vector<8x8xbf16>, vector<8x8xf32> -> vector<8x8xf32>
    %20 = arith.truncf %19 : vector<8x8xf32> to vector<8x8xbf16>
    %c0_6 = arith.constant 0 : index
    %c0_7 = arith.constant 0 : index
    %c0_8 = arith.constant 0 : index
    %21 = vector.load %arg2[%c0_6, %c0_7, %c0_8] : memref<1x8x32xbf16, #tpu.memory_space<vmem>>, vector<1x8x8xbf16>
    %22 = vector.shape_cast %21 : vector<1x8x8xbf16> to vector<8x8xbf16>
    %23 = vector.shape_cast %20 : vector<8x8xbf16> to vector<1x8x8xbf16>
    tpu.vector_store %arg2[%c0_6, %c0_7, %c0_8], %23 {strides = array<i32>} : memref<1x8x32xbf16, #tpu.memory_space<vmem>>, vector<1x8x8xbf16>,
    %24 = vector.extract_strided_slice %1 {offsets = [0, 8], sizes = [8, 8], strides = [1, 1]} : vector<8x96xbf16> to vector<8x8xbf16>
    %25 = vector.extract_strided_slice %1 {offsets = [0, 40], sizes = [8, 8], strides = [1, 1]} : vector<8x96xbf16> to vector<8x8xbf16>
    %26 = vector.extract_strided_slice %1 {offsets = [0, 72], sizes = [8, 8], strides = [1, 1]} : vector<8x96xbf16> to vector<8x8xbf16>
    %cst_9 = arith.constant dense<0.000000e+00> : vector<8x8xf32>
    %27 = tpu.matmul %24, %25, %cst_9 {dimension_numbers = #tpu.dot_dimension_numbers<[1], [1], [0], [0], [0, 0, 1, 0], [], []>} : vector<8x8xbf16>, vector<8x8xbf16>, vector<8x8xf32> -> vector<8x8xf32>
    %cst_10 = arith.constant 0.353553385 : f32
    %28 = vector.broadcast %cst_10 : f32 to vector<8x8xf32>
    %29 = arith.mulf %27, %28 : vector<8x8xf32>
    %cst_11 = arith.constant dense<0xFF800000> : vector<8xf32>
    %30 = vector.multi_reduction <maximumf>, %29, %cst_11 [1] : vector<8x8xf32> to vector<8xf32>
    %31 = vector.shape_cast %30 : vector<8xf32> to vector<8x1xf32>
    %32 = vector.broadcast %31 : vector<8x1xf32> to vector<8x8xf32>
    %33 = arith.subf %29, %32 : vector<8x8xf32>
    %34 = math.exp %33 : vector<8x8xf32>
    %cst_12 = arith.constant dense<0.000000e+00> : vector<8xf32>
    %35 = vector.multi_reduction <add>, %34, %cst_12 [1] : vector<8x8xf32> to vector<8xf32>
    %36 = vector.shape_cast %35 : vector<8xf32> to vector<8x1xf32>
    %37 = tpu.reciprocal %36 {approx = true} : vector<8x1xf32> -> vector<8x1xf32>
    %38 = vector.broadcast %37 : vector<8x1xf32> to vector<8x8xf32>
    %39 = arith.mulf %34, %38 : vector<8x8xf32>
    %40 = arith.truncf %39 : vector<8x8xf32> to vector<8x8xbf16>
    %cst_13 = arith.constant dense<0.000000e+00> : vector<8x8xf32>
    %41 = tpu.matmul %40, %26, %cst_13 {dimension_numbers = #tpu.dot_dimension_numbers<[1], [0], [0], [1], [0, 0, 1, 1], [], []>} : vector<8x8xbf16>, vector<8x8xbf16>, vector<8x8xf32> -> vector<8x8xf32>
    %42 = arith.truncf %41 : vector<8x8xf32> to vector<8x8xbf16>
    %c0_14 = arith.constant 0 : index
    %c0_15 = arith.constant 0 : index
    %c8 = arith.constant 8 : index
    %43 = vector.load %arg2[%c0_14, %c0_15, %c8] : memref<1x8x32xbf16, #tpu.memory_space<vmem>>, vector<1x8x8xbf16>
    %44 = vector.shape_cast %43 : vector<1x8x8xbf16> to vector<8x8xbf16>
    %45 = vector.shape_cast %42 : vector<8x8xbf16> to vector<1x8x8xbf16>
    tpu.vector_store %arg2[%c0_14, %c0_15, %c8], %45 {strides = array<i32>} : memref<1x8x32xbf16, #tpu.memory_space<vmem>>, vector<1x8x8xbf16>,
    %46 = vector.extract_strided_slice %1 {offsets = [0, 16], sizes = [8, 8], strides = [1, 1]} : vector<8x96xbf16> to vector<8x8xbf16>
    %47 = vector.extract_strided_slice %1 {offsets = [0, 48], sizes = [8, 8], strides = [1, 1]} : vector<8x96xbf16> to vector<8x8xbf16>
    %48 = vector.extract_strided_slice %1 {offsets = [0, 80], sizes = [8, 8], strides = [1, 1]} : vector<8x96xbf16> to vector<8x8xbf16>
    %cst_16 = arith.constant dense<0.000000e+00> : vector<8x8xf32>
    %49 = tpu.matmul %46, %47, %cst_16 {dimension_numbers = #tpu.dot_dimension_numbers<[1], [1], [0], [0], [0, 0, 1, 0], [], []>} : vector<8x8xbf16>, vector<8x8xbf16>, vector<8x8xf32> -> vector<8x8xf32>
    %cst_17 = arith.constant 0.353553385 : f32
    %50 = vector.broadcast %cst_17 : f32 to vector<8x8xf32>
    %51 = arith.mulf %49, %50 : vector<8x8xf32>
    %cst_18 = arith.constant dense<0xFF800000> : vector<8xf32>
    %52 = vector.multi_reduction <maximumf>, %51, %cst_18 [1] : vector<8x8xf32> to vector<8xf32>
    %53 = vector.shape_cast %52 : vector<8xf32> to vector<8x1xf32>
    %54 = vector.broadcast %53 : vector<8x1xf32> to vector<8x8xf32>
    %55 = arith.subf %51, %54 : vector<8x8xf32>
    %56 = math.exp %55 : vector<8x8xf32>
    %cst_19 = arith.constant dense<0.000000e+00> : vector<8xf32>
    %57 = vector.multi_reduction <add>, %56, %cst_19 [1] : vector<8x8xf32> to vector<8xf32>
    %58 = vector.shape_cast %57 : vector<8xf32> to vector<8x1xf32>
    %59 = tpu.reciprocal %58 {approx = true} : vector<8x1xf32> -> vector<8x1xf32>
    %60 = vector.broadcast %59 : vector<8x1xf32> to vector<8x8xf32>
    %61 = arith.mulf %56, %60 : vector<8x8xf32>
    %62 = arith.truncf %61 : vector<8x8xf32> to vector<8x8xbf16>
    %cst_20 = arith.constant dense<0.000000e+00> : vector<8x8xf32>
    %63 = tpu.matmul %62, %48, %cst_20 {dimension_numbers = #tpu.dot_dimension_numbers<[1], [0], [0], [1], [0, 0, 1, 1], [], []>} : vector<8x8xbf16>, vector<8x8xbf16>, vector<8x8xf32> -> vector<8x8xf32>
    %64 = arith.truncf %63 : vector<8x8xf32> to vector<8x8xbf16>
    %c0_21 = arith.constant 0 : index
    %c0_22 = arith.constant 0 : index
    %c16 = arith.constant 16 : index
    %65 = vector.load %arg2[%c0_21, %c0_22, %c16] : memref<1x8x32xbf16, #tpu.memory_space<vmem>>, vector<1x8x8xbf16>
    %66 = vector.shape_cast %65 : vector<1x8x8xbf16> to vector<8x8xbf16>
    %67 = vector.shape_cast %64 : vector<8x8xbf16> to vector<1x8x8xbf16>
    tpu.vector_store %arg2[%c0_21, %c0_22, %c16], %67 {strides = array<i32>} : memref<1x8x32xbf16, #tpu.memory_space<vmem>>, vector<1x8x8xbf16>,
    %68 = vector.extract_strided_slice %1 {offsets = [0, 24], sizes = [8, 8], strides = [1, 1]} : vector<8x96xbf16> to vector<8x8xbf16>
    %69 = vector.extract_strided_slice %1 {offsets = [0, 56], sizes = [8, 8], strides = [1, 1]} : vector<8x96xbf16> to vector<8x8xbf16>
    %70 = vector.extract_strided_slice %1 {offsets = [0, 88], sizes = [8, 8], strides = [1, 1]} : vector<8x96xbf16> to vector<8x8xbf16>
    %cst_23 = arith.constant dense<0.000000e+00> : vector<8x8xf32>
    %71 = tpu.matmul %68, %69, %cst_23 {dimension_numbers = #tpu.dot_dimension_numbers<[1], [1], [0], [0], [0, 0, 1, 0], [], []>} : vector<8x8xbf16>, vector<8x8xbf16>, vector<8x8xf32> -> vector<8x8xf32>
    %cst_24 = arith.constant 0.353553385 : f32
    %72 = vector.broadcast %cst_24 : f32 to vector<8x8xf32>
    %73 = arith.mulf %71, %72 : vector<8x8xf32>
    %cst_25 = arith.constant dense<0xFF800000> : vector<8xf32>
    %74 = vector.multi_reduction <maximumf>, %73, %cst_25 [1] : vector<8x8xf32> to vector<8xf32>
    %75 = vector.shape_cast %74 : vector<8xf32> to vector<8x1xf32>
    %76 = vector.broadcast %75 : vector<8x1xf32> to vector<8x8xf32>
    %77 = arith.subf %73, %76 : vector<8x8xf32>
    %78 = math.exp %77 : vector<8x8xf32>
    %cst_26 = arith.constant dense<0.000000e+00> : vector<8xf32>
    %79 = vector.multi_reduction <add>, %78, %cst_26 [1] : vector<8x8xf32> to vector<8xf32>
    %80 = vector.shape_cast %79 : vector<8xf32> to vector<8x1xf32>
    %81 = tpu.reciprocal %80 {approx = true} : vector<8x1xf32> -> vector<8x1xf32>
    %82 = vector.broadcast %81 : vector<8x1xf32> to vector<8x8xf32>
    %83 = arith.mulf %78, %82 : vector<8x8xf32>
    %84 = arith.truncf %83 : vector<8x8xf32> to vector<8x8xbf16>
    %cst_27 = arith.constant dense<0.000000e+00> : vector<8x8xf32>
    %85 = tpu.matmul %84, %70, %cst_27 {dimension_numbers = #tpu.dot_dimension_numbers<[1], [0], [0], [1], [0, 0, 1, 1], [], []>} : vector<8x8xbf16>, vector<8x8xbf16>, vector<8x8xf32> -> vector<8x8xf32>
    %86 = arith.truncf %85 : vector<8x8xf32> to vector<8x8xbf16>
    %c0_28 = arith.constant 0 : index
    %c0_29 = arith.constant 0 : index
    %c24 = arith.constant 24 : index
    %87 = vector.load %arg2[%c0_28, %c0_29, %c24] : memref<1x8x32xbf16, #tpu.memory_space<vmem>>, vector<1x8x8xbf16>
    %88 = vector.shape_cast %87 : vector<1x8x8xbf16> to vector<8x8xbf16>
    %89 = vector.shape_cast %86 : vector<8x8xbf16> to vector<1x8x8xbf16>
    tpu.vector_store %arg2[%c0_28, %c0_29, %c24], %89 {strides = array<i32>} : memref<1x8x32xbf16, #tpu.memory_space<vmem>>, vector<1x8x8xbf16>,
    return
  }
  func.func @transform_0(%arg0: i32) -> (i32, i32, i32) {
    %c0_i32 = arith.constant 0 : i32
    %c0_i32_0 = arith.constant 0 : i32
    %c0_i32_1 = arith.constant 0 : i32
    return %arg0, %c0_i32, %c0_i32_0 : i32, i32, i32
  }
  func.func @transform_1(%arg0: i32) -> (i32, i32, i32) {
    %c0_i32 = arith.constant 0 : i32
    %c0_i32_0 = arith.constant 0 : i32
    %c0_i32_1 = arith.constant 0 : i32
    return %arg0, %c0_i32, %c0_i32_0 : i32, i32, i32
  }
}

module attributes {stable_mosaic.version = 11 : i64} {
  func.func @_matmul_res_ln_kernel(%arg0: i32, %arg1: i32, %arg2: memref<16x32xbf16, #tpu.memory_space<vmem>>, %arg3: memref<32x32xbf16, #tpu.memory_space<vmem>>, %arg4: memref<1x32xbf16, #tpu.memory_space<vmem>>, %arg5: memref<16x32xbf16, #tpu.memory_space<vmem>>, %arg6: memref<1x32xbf16, #tpu.memory_space<vmem>>, %arg7: memref<1x32xbf16, #tpu.memory_space<vmem>>, %arg8: memref<16x32xbf16, #tpu.memory_space<vmem>>, %arg9: memref<16x32xf32, #tpu.memory_space<vmem>>) attributes {dimension_semantics = [#tpu.dimension_semantics<parallel>, #tpu.dimension_semantics<arbitrary>], iteration_bounds = array<i64: 1, 1>, scalar_prefetch = 0 : i64, scratch_operands = 1 : i64, tpu.core_type = #tpu.core_type<tc>, window_params = [{transform_indices = @transform_0, window_bounds = array<i64: 16, 32>}, {transform_indices = @transform_1, window_bounds = array<i64: 32, 32>}, {pipeline_mode = #tpu.pipeline_mode<synchronous>, transform_indices = @transform_2, window_bounds = array<i64: 1, 32>}, {transform_indices = @transform_3, window_bounds = array<i64: 16, 32>}, {pipeline_mode = #tpu.pipeline_mode<synchronous>, transform_indices = @transform_4, window_bounds = array<i64: 1, 32>}, {pipeline_mode = #tpu.pipeline_mode<synchronous>, transform_indices = @transform_5, window_bounds = array<i64: 1, 32>}, {transform_indices = @transform_6, window_bounds = array<i64: 16, 32>}]} {
    %c0_i32 = arith.constant 0 : i32
    %0 = arith.cmpi eq, %arg1, %c0_i32 : i32
    %1 = arith.extui %0 : i1 to i32
    %c0_i32_0 = arith.constant 0 : i32
    %2 = arith.cmpi ne, %1, %c0_i32_0 : i32
    scf.if %2 {
      %cst_10 = arith.constant 0.000000e+00 : f32
      %12 = vector.broadcast %cst_10 : f32 to vector<16x32xf32>
      %c0_11 = arith.constant 0 : index
      %c0_12 = arith.constant 0 : index
      %13 = vector.load %arg9[%c0_11, %c0_12] : memref<16x32xf32, #tpu.memory_space<vmem>>, vector<16x32xf32>
      tpu.vector_store %arg9[%c0_11, %c0_12], %12 {strides = array<i32>} : memref<16x32xf32, #tpu.memory_space<vmem>>, vector<16x32xf32>,
    } else {
    }
    %c0 = arith.constant 0 : index
    %c0_1 = arith.constant 0 : index
    %3 = vector.load %arg9[%c0, %c0_1] : memref<16x32xf32, #tpu.memory_space<vmem>>, vector<16x32xf32>
    %c0_2 = arith.constant 0 : index
    %c0_3 = arith.constant 0 : index
    %4 = vector.load %arg2[%c0_2, %c0_3] : memref<16x32xbf16, #tpu.memory_space<vmem>>, vector<16x32xbf16>
    %c0_4 = arith.constant 0 : index
    %c0_5 = arith.constant 0 : index
    %5 = vector.load %arg3[%c0_4, %c0_5] : memref<32x32xbf16, #tpu.memory_space<vmem>>, vector<32x32xbf16>
    %cst = arith.constant dense<0.000000e+00> : vector<16x32xf32>
    %6 = tpu.matmul %4, %5, %cst {dimension_numbers = #tpu.dot_dimension_numbers<[1], [0], [0], [1], [0, 0, 1, 1], [], []>} : vector<16x32xbf16>, vector<32x32xbf16>, vector<16x32xf32> -> vector<16x32xf32>
    %7 = arith.addf %3, %6 : vector<16x32xf32>
    %c0_6 = arith.constant 0 : index
    %c0_7 = arith.constant 0 : index
    %8 = vector.load %arg9[%c0_6, %c0_7] : memref<16x32xf32, #tpu.memory_space<vmem>>, vector<16x32xf32>
    tpu.vector_store %arg9[%c0_6, %c0_7], %7 {strides = array<i32>} : memref<16x32xf32, #tpu.memory_space<vmem>>, vector<16x32xf32>,
    %c0_i32_8 = arith.constant 0 : i32
    %9 = arith.cmpi eq, %arg1, %c0_i32_8 : i32
    %10 = arith.extui %9 : i1 to i32
    %c0_i32_9 = arith.constant 0 : i32
    %11 = arith.cmpi ne, %10, %c0_i32_9 : i32
    scf.if %11 {
      %c0_10 = arith.constant 0 : index
      %c0_11 = arith.constant 0 : index
      %12 = vector.load %arg9[%c0_10, %c0_11] : memref<16x32xf32, #tpu.memory_space<vmem>>, vector<16x32xf32>
      %c0_12 = arith.constant 0 : index
      %c0_13 = arith.constant 0 : index
      %13 = vector.load %arg4[%c0_12, %c0_13] : memref<1x32xbf16, #tpu.memory_space<vmem>>, vector<1x32xbf16>
      %14 = arith.extf %13 : vector<1x32xbf16> to vector<1x32xf32>
      %15 = vector.broadcast %14 : vector<1x32xf32> to vector<16x32xf32>
      %16 = arith.addf %12, %15 : vector<16x32xf32>
      %c0_14 = arith.constant 0 : index
      %c0_15 = arith.constant 0 : index
      %17 = vector.load %arg5[%c0_14, %c0_15] : memref<16x32xbf16, #tpu.memory_space<vmem>>, vector<16x32xbf16>
      %18 = arith.extf %17 : vector<16x32xbf16> to vector<16x32xf32>
      %19 = arith.addf %16, %18 : vector<16x32xf32>
      %cst_16 = arith.constant dense<0.000000e+00> : vector<16xf32>
      %20 = vector.multi_reduction <add>, %19, %cst_16 [1] : vector<16x32xf32> to vector<16xf32>
      %21 = vector.shape_cast %20 : vector<16xf32> to vector<16x1xf32>
      %cst_17 = arith.constant 3.200000e+01 : f32
      %22 = vector.broadcast %cst_17 : f32 to vector<16x1xf32>
      %23 = arith.divf %21, %22 : vector<16x1xf32>
      %24 = vector.broadcast %23 : vector<16x1xf32> to vector<16x32xf32>
      %25 = arith.subf %19, %24 : vector<16x32xf32>
      %26 = vector.broadcast %23 : vector<16x1xf32> to vector<16x32xf32>
      %27 = arith.subf %19, %26 : vector<16x32xf32>
      %28 = arith.mulf %25, %27 : vector<16x32xf32>
      %cst_18 = arith.constant dense<0.000000e+00> : vector<16xf32>
      %29 = vector.multi_reduction <add>, %28, %cst_18 [1] : vector<16x32xf32> to vector<16xf32>
      %30 = vector.shape_cast %29 : vector<16xf32> to vector<16x1xf32>
      %cst_19 = arith.constant 3.200000e+01 : f32
      %31 = vector.broadcast %cst_19 : f32 to vector<16x1xf32>
      %32 = arith.divf %30, %31 : vector<16x1xf32>
      %33 = vector.broadcast %23 : vector<16x1xf32> to vector<16x32xf32>
      %34 = arith.subf %19, %33 : vector<16x32xf32>
      %cst_20 = arith.constant 9.99999974E-6 : f32
      %35 = vector.broadcast %cst_20 : f32 to vector<16x1xf32>
      %36 = arith.addf %32, %35 : vector<16x1xf32>
      %37 = math.rsqrt %36 : vector<16x1xf32>
      %38 = vector.broadcast %37 : vector<16x1xf32> to vector<16x32xf32>
      %39 = arith.mulf %34, %38 : vector<16x32xf32>
      %c0_21 = arith.constant 0 : index
      %c0_22 = arith.constant 0 : index
      %40 = vector.load %arg6[%c0_21, %c0_22] : memref<1x32xbf16, #tpu.memory_space<vmem>>, vector<1x32xbf16>
      %41 = arith.extf %40 : vector<1x32xbf16> to vector<1x32xf32>
      %42 = vector.broadcast %41 : vector<1x32xf32> to vector<16x32xf32>
      %43 = arith.mulf %39, %42 : vector<16x32xf32>
      %c0_23 = arith.constant 0 : index
      %c0_24 = arith.constant 0 : index
      %44 = vector.load %arg7[%c0_23, %c0_24] : memref<1x32xbf16, #tpu.memory_space<vmem>>, vector<1x32xbf16>
      %45 = arith.extf %44 : vector<1x32xbf16> to vector<1x32xf32>
      %46 = vector.broadcast %45 : vector<1x32xf32> to vector<16x32xf32>
      %47 = arith.addf %43, %46 : vector<16x32xf32>
      %48 = arith.truncf %47 : vector<16x32xf32> to vector<16x32xbf16>
      %c0_25 = arith.constant 0 : index
      %c0_26 = arith.constant 0 : index
      %49 = vector.load %arg8[%c0_25, %c0_26] : memref<16x32xbf16, #tpu.memory_space<vmem>>, vector<16x32xbf16>
      tpu.vector_store %arg8[%c0_25, %c0_26], %48 {strides = array<i32>} : memref<16x32xbf16, #tpu.memory_space<vmem>>, vector<16x32xbf16>,
    } else {
    }
    return
  }
  func.func @transform_0(%arg0: i32, %arg1: i32) -> (i32, i32) {
    %c0_i32 = arith.constant 0 : i32
    return %arg0, %arg1 : i32, i32
  }
  func.func @transform_1(%arg0: i32, %arg1: i32) -> (i32, i32) {
    %c0_i32 = arith.constant 0 : i32
    %c0_i32_0 = arith.constant 0 : i32
    return %arg1, %c0_i32 : i32, i32
  }
  func.func @transform_2(%arg0: i32, %arg1: i32) -> (i32, i32) {
    %c0_i32 = arith.constant 0 : i32
    %c0_i32_0 = arith.constant 0 : i32
    %c0_i32_1 = arith.constant 0 : i32
    return %c0_i32, %c0_i32_0 : i32, i32
  }
  func.func @transform_3(%arg0: i32, %arg1: i32) -> (i32, i32) {
    %c0_i32 = arith.constant 0 : i32
    %c0_i32_0 = arith.constant 0 : i32
    return %arg0, %c0_i32 : i32, i32
  }
  func.func @transform_4(%arg0: i32, %arg1: i32) -> (i32, i32) {
    %c0_i32 = arith.constant 0 : i32
    %c0_i32_0 = arith.constant 0 : i32
    %c0_i32_1 = arith.constant 0 : i32
    return %c0_i32, %c0_i32_0 : i32, i32
  }
  func.func @transform_5(%arg0: i32, %arg1: i32) -> (i32, i32) {
    %c0_i32 = arith.constant 0 : i32
    %c0_i32_0 = arith.constant 0 : i32
    %c0_i32_1 = arith.constant 0 : i32
    return %c0_i32, %c0_i32_0 : i32, i32
  }
  func.func @transform_6(%arg0: i32, %arg1: i32) -> (i32, i32) {
    %c0_i32 = arith.constant 0 : i32
    %c0_i32_0 = arith.constant 0 : i32
    return %arg0, %c0_i32 : i32, i32
  }
}

module attributes {stable_mosaic.version = 11 : i64} {
  func.func @_ffn_res_ln_kernel(%arg0: i32, %arg1: i32, %arg2: memref<16x32xbf16, #tpu.memory_space<vmem>>, %arg3: memref<32x64xbf16, #tpu.memory_space<vmem>>, %arg4: memref<1x64xbf16, #tpu.memory_space<vmem>>, %arg5: memref<64x32xbf16, #tpu.memory_space<vmem>>, %arg6: memref<1x32xbf16, #tpu.memory_space<vmem>>, %arg7: memref<16x32xbf16, #tpu.memory_space<vmem>>, %arg8: memref<1x32xbf16, #tpu.memory_space<vmem>>, %arg9: memref<1x32xbf16, #tpu.memory_space<vmem>>, %arg10: memref<16x32xbf16, #tpu.memory_space<vmem>>, %arg11: memref<16x32xf32, #tpu.memory_space<vmem>>) attributes {dimension_semantics = [#tpu.dimension_semantics<parallel>, #tpu.dimension_semantics<arbitrary>], iteration_bounds = array<i64: 1, 1>, scalar_prefetch = 0 : i64, scratch_operands = 1 : i64, tpu.core_type = #tpu.core_type<tc>, window_params = [{transform_indices = @transform_0, window_bounds = array<i64: 16, 32>}, {transform_indices = @transform_1, window_bounds = array<i64: 32, 64>}, {transform_indices = @transform_2, window_bounds = array<i64: 1, 64>}, {transform_indices = @transform_3, window_bounds = array<i64: 64, 32>}, {pipeline_mode = #tpu.pipeline_mode<synchronous>, transform_indices = @transform_4, window_bounds = array<i64: 1, 32>}, {transform_indices = @transform_5, window_bounds = array<i64: 16, 32>}, {pipeline_mode = #tpu.pipeline_mode<synchronous>, transform_indices = @transform_6, window_bounds = array<i64: 1, 32>}, {pipeline_mode = #tpu.pipeline_mode<synchronous>, transform_indices = @transform_7, window_bounds = array<i64: 1, 32>}, {transform_indices = @transform_8, window_bounds = array<i64: 16, 32>}]} {
    %c0_i32 = arith.constant 0 : i32
    %0 = arith.cmpi eq, %arg1, %c0_i32 : i32
    %1 = arith.extui %0 : i1 to i32
    %c0_i32_0 = arith.constant 0 : i32
    %2 = arith.cmpi ne, %1, %c0_i32_0 : i32
    scf.if %2 {
      %cst_16 = arith.constant 0.000000e+00 : f32
      %21 = vector.broadcast %cst_16 : f32 to vector<16x32xf32>
      %c0_17 = arith.constant 0 : index
      %c0_18 = arith.constant 0 : index
      %22 = vector.load %arg11[%c0_17, %c0_18] : memref<16x32xf32, #tpu.memory_space<vmem>>, vector<16x32xf32>
      tpu.vector_store %arg11[%c0_17, %c0_18], %21 {strides = array<i32>} : memref<16x32xf32, #tpu.memory_space<vmem>>, vector<16x32xf32>,
    } else {
    }
    %c0 = arith.constant 0 : index
    %c0_1 = arith.constant 0 : index
    %3 = vector.load %arg2[%c0, %c0_1] : memref<16x32xbf16, #tpu.memory_space<vmem>>, vector<16x32xbf16>
    %c0_2 = arith.constant 0 : index
    %c0_3 = arith.constant 0 : index
    %4 = vector.load %arg3[%c0_2, %c0_3] : memref<32x64xbf16, #tpu.memory_space<vmem>>, vector<32x64xbf16>
    %cst = arith.constant dense<0.000000e+00> : vector<16x64xf32>
    %5 = tpu.matmul %3, %4, %cst {dimension_numbers = #tpu.dot_dimension_numbers<[1], [0], [0], [1], [0, 0, 1, 1], [], []>} : vector<16x32xbf16>, vector<32x64xbf16>, vector<16x64xf32> -> vector<16x64xf32>
    %c0_4 = arith.constant 0 : index
    %c0_5 = arith.constant 0 : index
    %6 = vector.load %arg4[%c0_4, %c0_5] : memref<1x64xbf16, #tpu.memory_space<vmem>>, vector<1x64xbf16>
    %7 = arith.extf %6 : vector<1x64xbf16> to vector<1x64xf32>
    %8 = vector.broadcast %7 : vector<1x64xf32> to vector<16x64xf32>
    %9 = arith.addf %5, %8 : vector<16x64xf32>
    %cst_6 = arith.constant 0.000000e+00 : f32
    %10 = vector.broadcast %cst_6 : f32 to vector<16x64xf32>
    %11 = arith.maximumf %9, %10 : vector<16x64xf32>
    %c0_7 = arith.constant 0 : index
    %c0_8 = arith.constant 0 : index
    %12 = vector.load %arg11[%c0_7, %c0_8] : memref<16x32xf32, #tpu.memory_space<vmem>>, vector<16x32xf32>
    %13 = arith.truncf %11 : vector<16x64xf32> to vector<16x64xbf16>
    %c0_9 = arith.constant 0 : index
    %c0_10 = arith.constant 0 : index
    %14 = vector.load %arg5[%c0_9, %c0_10] : memref<64x32xbf16, #tpu.memory_space<vmem>>, vector<64x32xbf16>
    %cst_11 = arith.constant dense<0.000000e+00> : vector<16x32xf32>
    %15 = tpu.matmul %13, %14, %cst_11 {dimension_numbers = #tpu.dot_dimension_numbers<[1], [0], [0], [1], [0, 0, 1, 1], [], []>} : vector<16x64xbf16>, vector<64x32xbf16>, vector<16x32xf32> -> vector<16x32xf32>
    %16 = arith.addf %12, %15 : vector<16x32xf32>
    %c0_12 = arith.constant 0 : index
    %c0_13 = arith.constant 0 : index
    %17 = vector.load %arg11[%c0_12, %c0_13] : memref<16x32xf32, #tpu.memory_space<vmem>>, vector<16x32xf32>
    tpu.vector_store %arg11[%c0_12, %c0_13], %16 {strides = array<i32>} : memref<16x32xf32, #tpu.memory_space<vmem>>, vector<16x32xf32>,
    %c0_i32_14 = arith.constant 0 : i32
    %18 = arith.cmpi eq, %arg1, %c0_i32_14 : i32
    %19 = arith.extui %18 : i1 to i32
    %c0_i32_15 = arith.constant 0 : i32
    %20 = arith.cmpi ne, %19, %c0_i32_15 : i32
    scf.if %20 {
      %c0_16 = arith.constant 0 : index
      %c0_17 = arith.constant 0 : index
      %21 = vector.load %arg11[%c0_16, %c0_17] : memref<16x32xf32, #tpu.memory_space<vmem>>, vector<16x32xf32>
      %c0_18 = arith.constant 0 : index
      %c0_19 = arith.constant 0 : index
      %22 = vector.load %arg6[%c0_18, %c0_19] : memref<1x32xbf16, #tpu.memory_space<vmem>>, vector<1x32xbf16>
      %23 = arith.extf %22 : vector<1x32xbf16> to vector<1x32xf32>
      %24 = vector.broadcast %23 : vector<1x32xf32> to vector<16x32xf32>
      %25 = arith.addf %21, %24 : vector<16x32xf32>
      %c0_20 = arith.constant 0 : index
      %c0_21 = arith.constant 0 : index
      %26 = vector.load %arg7[%c0_20, %c0_21] : memref<16x32xbf16, #tpu.memory_space<vmem>>, vector<16x32xbf16>
      %27 = arith.extf %26 : vector<16x32xbf16> to vector<16x32xf32>
      %28 = arith.addf %25, %27 : vector<16x32xf32>
      %cst_22 = arith.constant dense<0.000000e+00> : vector<16xf32>
      %29 = vector.multi_reduction <add>, %28, %cst_22 [1] : vector<16x32xf32> to vector<16xf32>
      %30 = vector.shape_cast %29 : vector<16xf32> to vector<16x1xf32>
      %cst_23 = arith.constant 3.200000e+01 : f32
      %31 = vector.broadcast %cst_23 : f32 to vector<16x1xf32>
      %32 = arith.divf %30, %31 : vector<16x1xf32>
      %33 = vector.broadcast %32 : vector<16x1xf32> to vector<16x32xf32>
      %34 = arith.subf %28, %33 : vector<16x32xf32>
      %35 = vector.broadcast %32 : vector<16x1xf32> to vector<16x32xf32>
      %36 = arith.subf %28, %35 : vector<16x32xf32>
      %37 = arith.mulf %34, %36 : vector<16x32xf32>
      %cst_24 = arith.constant dense<0.000000e+00> : vector<16xf32>
      %38 = vector.multi_reduction <add>, %37, %cst_24 [1] : vector<16x32xf32> to vector<16xf32>
      %39 = vector.shape_cast %38 : vector<16xf32> to vector<16x1xf32>
      %cst_25 = arith.constant 3.200000e+01 : f32
      %40 = vector.broadcast %cst_25 : f32 to vector<16x1xf32>
      %41 = arith.divf %39, %40 : vector<16x1xf32>
      %42 = vector.broadcast %32 : vector<16x1xf32> to vector<16x32xf32>
      %43 = arith.subf %28, %42 : vector<16x32xf32>
      %cst_26 = arith.constant 9.99999974E-6 : f32
      %44 = vector.broadcast %cst_26 : f32 to vector<16x1xf32>
      %45 = arith.addf %41, %44 : vector<16x1xf32>
      %46 = math.rsqrt %45 : vector<16x1xf32>
      %47 = vector.broadcast %46 : vector<16x1xf32> to vector<16x32xf32>
      %48 = arith.mulf %43, %47 : vector<16x32xf32>
      %c0_27 = arith.constant 0 : index
      %c0_28 = arith.constant 0 : index
      %49 = vector.load %arg8[%c0_27, %c0_28] : memref<1x32xbf16, #tpu.memory_space<vmem>>, vector<1x32xbf16>
      %50 = arith.extf %49 : vector<1x32xbf16> to vector<1x32xf32>
      %51 = vector.broadcast %50 : vector<1x32xf32> to vector<16x32xf32>
      %52 = arith.mulf %48, %51 : vector<16x32xf32>
      %c0_29 = arith.constant 0 : index
      %c0_30 = arith.constant 0 : index
      %53 = vector.load %arg9[%c0_29, %c0_30] : memref<1x32xbf16, #tpu.memory_space<vmem>>, vector<1x32xbf16>
      %54 = arith.extf %53 : vector<1x32xbf16> to vector<1x32xf32>
      %55 = vector.broadcast %54 : vector<1x32xf32> to vector<16x32xf32>
      %56 = arith.addf %52, %55 : vector<16x32xf32>
      %57 = arith.truncf %56 : vector<16x32xf32> to vector<16x32xbf16>
      %c0_31 = arith.constant 0 : index
      %c0_32 = arith.constant 0 : index
      %58 = vector.load %arg10[%c0_31, %c0_32] : memref<16x32xbf16, #tpu.memory_space<vmem>>, vector<16x32xbf16>
      tpu.vector_store %arg10[%c0_31, %c0_32], %57 {strides = array<i32>} : memref<16x32xbf16, #tpu.memory_space<vmem>>, vector<16x32xbf16>,
    } else {
    }
    return
  }
  func.func @transform_0(%arg0: i32, %arg1: i32) -> (i32, i32) {
    %c0_i32 = arith.constant 0 : i32
    %c0_i32_0 = arith.constant 0 : i32
    return %arg0, %c0_i32 : i32, i32
  }
  func.func @transform_1(%arg0: i32, %arg1: i32) -> (i32, i32) {
    %c0_i32 = arith.constant 0 : i32
    %c0_i32_0 = arith.constant 0 : i32
    return %c0_i32, %arg1 : i32, i32
  }
  func.func @transform_2(%arg0: i32, %arg1: i32) -> (i32, i32) {
    %c0_i32 = arith.constant 0 : i32
    %c0_i32_0 = arith.constant 0 : i32
    return %c0_i32, %arg1 : i32, i32
  }
  func.func @transform_3(%arg0: i32, %arg1: i32) -> (i32, i32) {
    %c0_i32 = arith.constant 0 : i32
    %c0_i32_0 = arith.constant 0 : i32
    return %arg1, %c0_i32 : i32, i32
  }
  func.func @transform_4(%arg0: i32, %arg1: i32) -> (i32, i32) {
    %c0_i32 = arith.constant 0 : i32
    %c0_i32_0 = arith.constant 0 : i32
    %c0_i32_1 = arith.constant 0 : i32
    return %c0_i32, %c0_i32_0 : i32, i32
  }
  func.func @transform_5(%arg0: i32, %arg1: i32) -> (i32, i32) {
    %c0_i32 = arith.constant 0 : i32
    %c0_i32_0 = arith.constant 0 : i32
    return %arg0, %c0_i32 : i32, i32
  }
  func.func @transform_6(%arg0: i32, %arg1: i32) -> (i32, i32) {
    %c0_i32 = arith.constant 0 : i32
    %c0_i32_0 = arith.constant 0 : i32
    %c0_i32_1 = arith.constant 0 : i32
    return %c0_i32, %c0_i32_0 : i32, i32
  }
  func.func @transform_7(%arg0: i32, %arg1: i32) -> (i32, i32) {
    %c0_i32 = arith.constant 0 : i32
    %c0_i32_0 = arith.constant 0 : i32
    %c0_i32_1 = arith.constant 0 : i32
    return %c0_i32, %c0_i32_0 : i32, i32
  }
  func.func @transform_8(%arg0: i32, %arg1: i32) -> (i32, i32) {
    %c0_i32 = arith.constant 0 : i32
    %c0_i32_0 = arith.constant 0 : i32
    return %arg0, %c0_i32 : i32, i32
  }
}

module attributes {stable_mosaic.version = 11 : i64} {
  func.func @_ffn_res_ln_kernel(%arg0: i32, %arg1: i32, %arg2: memref<16x32xbf16, #tpu.memory_space<vmem>>, %arg3: memref<32x64xbf16, #tpu.memory_space<vmem>>, %arg4: memref<1x64xbf16, #tpu.memory_space<vmem>>, %arg5: memref<64x32xbf16, #tpu.memory_space<vmem>>, %arg6: memref<1x32xbf16, #tpu.memory_space<vmem>>, %arg7: memref<16x32xbf16, #tpu.memory_space<vmem>>, %arg8: memref<1x32xbf16, #tpu.memory_space<vmem>>, %arg9: memref<1x32xbf16, #tpu.memory_space<vmem>>, %arg10: memref<16x32xbf16, #tpu.memory_space<vmem>>, %arg11: memref<16x32xf32, #tpu.memory_space<vmem>>) attributes {dimension_semantics = [#tpu.dimension_semantics<parallel>, #tpu.dimension_semantics<arbitrary>], iteration_bounds = array<i64: 1, 1>, scalar_prefetch = 0 : i64, scratch_operands = 1 : i64, tpu.core_type = #tpu.core_type<tc>, window_params = [{transform_indices = @transform_0, window_bounds = array<i64: 16, 32>}, {transform_indices = @transform_1, window_bounds = array<i64: 32, 64>}, {transform_indices = @transform_2, window_bounds = array<i64: 1, 64>}, {transform_indices = @transform_3, window_bounds = array<i64: 64, 32>}, {pipeline_mode = #tpu.pipeline_mode<synchronous>, transform_indices = @transform_4, window_bounds = array<i64: 1, 32>}, {transform_indices = @transform_5, window_bounds = array<i64: 16, 32>}, {pipeline_mode = #tpu.pipeline_mode<synchronous>, transform_indices = @transform_6, window_bounds = array<i64: 1, 32>}, {pipeline_mode = #tpu.pipeline_mode<synchronous>, transform_indices = @transform_7, window_bounds = array<i64: 1, 32>}, {transform_indices = @transform_8, window_bounds = array<i64: 16, 32>}]} {
    %c0_i32 = arith.constant 0 : i32
    %0 = arith.cmpi eq, %arg1, %c0_i32 : i32
    %1 = arith.extui %0 : i1 to i32
    %c0_i32_0 = arith.constant 0 : i32
    %2 = arith.cmpi ne, %1, %c0_i32_0 : i32
    scf.if %2 {
      %cst_16 = arith.constant 0.000000e+00 : f32
      %21 = vector.broadcast %cst_16 : f32 to vector<16x32xf32>
      %c0_17 = arith.constant 0 : index
      %c0_18 = arith.constant 0 : index
      %22 = vector.load %arg11[%c0_17, %c0_18] : memref<16x32xf32, #tpu.memory_space<vmem>>, vector<16x32xf32>
      tpu.vector_store %arg11[%c0_17, %c0_18], %21 {strides = array<i32>} : memref<16x32xf32, #tpu.memory_space<vmem>>, vector<16x32xf32>,
    } else {
    }
    %c0 = arith.constant 0 : index
    %c0_1 = arith.constant 0 : index
    %3 = vector.load %arg2[%c0, %c0_1] : memref<16x32xbf16, #tpu.memory_space<vmem>>, vector<16x32xbf16>
    %c0_2 = arith.constant 0 : index
    %c0_3 = arith.constant 0 : index
    %4 = vector.load %arg3[%c0_2, %c0_3] : memref<32x64xbf16, #tpu.memory_space<vmem>>, vector<32x64xbf16>
    %cst = arith.constant dense<0.000000e+00> : vector<16x64xf32>
    %5 = tpu.matmul %3, %4, %cst {dimension_numbers = #tpu.dot_dimension_numbers<[1], [0], [0], [1], [0, 0, 1, 1], [], []>} : vector<16x32xbf16>, vector<32x64xbf16>, vector<16x64xf32> -> vector<16x64xf32>
    %c0_4 = arith.constant 0 : index
    %c0_5 = arith.constant 0 : index
    %6 = vector.load %arg4[%c0_4, %c0_5] : memref<1x64xbf16, #tpu.memory_space<vmem>>, vector<1x64xbf16>
    %7 = arith.extf %6 : vector<1x64xbf16> to vector<1x64xf32>
    %8 = vector.broadcast %7 : vector<1x64xf32> to vector<16x64xf32>
    %9 = arith.addf %5, %8 : vector<16x64xf32>
    %cst_6 = arith.constant 0.000000e+00 : f32
    %10 = vector.broadcast %cst_6 : f32 to vector<16x64xf32>
    %11 = arith.maximumf %9, %10 : vector<16x64xf32>
    %c0_7 = arith.constant 0 : index
    %c0_8 = arith.constant 0 : index
    %12 = vector.load %arg11[%c0_7, %c0_8] : memref<16x32xf32, #tpu.memory_space<vmem>>, vector<16x32xf32>
    %13 = arith.truncf %11 : vector<16x64xf32> to vector<16x64xbf16>
    %c0_9 = arith.constant 0 : index
    %c0_10 = arith.constant 0 : index
    %14 = vector.load %arg5[%c0_9, %c0_10] : memref<64x32xbf16, #tpu.memory_space<vmem>>, vector<64x32xbf16>
    %cst_11 = arith.constant dense<0.000000e+00> : vector<16x32xf32>
    %15 = tpu.matmul %13, %14, %cst_11 {dimension_numbers = #tpu.dot_dimension_numbers<[1], [0], [0], [1], [0, 0, 1, 1], [], []>} : vector<16x64xbf16>, vector<64x32xbf16>, vector<16x32xf32> -> vector<16x32xf32>
    %16 = arith.addf %12, %15 : vector<16x32xf32>
    %c0_12 = arith.constant 0 : index
    %c0_13 = arith.constant 0 : index
    %17 = vector.load %arg11[%c0_12, %c0_13] : memref<16x32xf32, #tpu.memory_space<vmem>>, vector<16x32xf32>
    tpu.vector_store %arg11[%c0_12, %c0_13], %16 {strides = array<i32>} : memref<16x32xf32, #tpu.memory_space<vmem>>, vector<16x32xf32>,
    %c0_i32_14 = arith.constant 0 : i32
    %18 = arith.cmpi eq, %arg1, %c0_i32_14 : i32
    %19 = arith.extui %18 : i1 to i32
    %c0_i32_15 = arith.constant 0 : i32
    %20 = arith.cmpi ne, %19, %c0_i32_15 : i32
    scf.if %20 {
      %c0_16 = arith.constant 0 : index
      %c0_17 = arith.constant 0 : index
      %21 = vector.load %arg11[%c0_16, %c0_17] : memref<16x32xf32, #tpu.memory_space<vmem>>, vector<16x32xf32>
      %c0_18 = arith.constant 0 : index
      %c0_19 = arith.constant 0 : index
      %22 = vector.load %arg6[%c0_18, %c0_19] : memref<1x32xbf16, #tpu.memory_space<vmem>>, vector<1x32xbf16>
      %23 = arith.extf %22 : vector<1x32xbf16> to vector<1x32xf32>
      %24 = vector.broadcast %23 : vector<1x32xf32> to vector<16x32xf32>
      %25 = arith.addf %21, %24 : vector<16x32xf32>
      %c0_20 = arith.constant 0 : index
      %c0_21 = arith.constant 0 : index
      %26 = vector.load %arg7[%c0_20, %c0_21] : memref<16x32xbf16, #tpu.memory_space<vmem>>, vector<16x32xbf16>
      %27 = arith.extf %26 : vector<16x32xbf16> to vector<16x32xf32>
      %28 = arith.addf %25, %27 : vector<16x32xf32>
      %cst_22 = arith.constant dense<0.000000e+00> : vector<16xf32>
      %29 = vector.multi_reduction <add>, %28, %cst_22 [1] : vector<16x32xf32> to vector<16xf32>
      %30 = vector.shape_cast %29 : vector<16xf32> to vector<16x1xf32>
      %cst_23 = arith.constant 3.200000e+01 : f32
      %31 = vector.broadcast %cst_23 : f32 to vector<16x1xf32>
      %32 = arith.divf %30, %31 : vector<16x1xf32>
      %33 = vector.broadcast %32 : vector<16x1xf32> to vector<16x32xf32>
      %34 = arith.subf %28, %33 : vector<16x32xf32>
      %35 = vector.broadcast %32 : vector<16x1xf32> to vector<16x32xf32>
      %36 = arith.subf %28, %35 : vector<16x32xf32>
      %37 = arith.mulf %34, %36 : vector<16x32xf32>
      %cst_24 = arith.constant dense<0.000000e+00> : vector<16xf32>
      %38 = vector.multi_reduction <add>, %37, %cst_24 [1] : vector<16x32xf32> to vector<16xf32>
      %39 = vector.shape_cast %38 : vector<16xf32> to vector<16x1xf32>
      %cst_25 = arith.constant 3.200000e+01 : f32
      %40 = vector.broadcast %cst_25 : f32 to vector<16x1xf32>
      %41 = arith.divf %39, %40 : vector<16x1xf32>
      %42 = vector.broadcast %32 : vector<16x1xf32> to vector<16x32xf32>
      %43 = arith.subf %28, %42 : vector<16x32xf32>
      %cst_26 = arith.constant 9.99999974E-6 : f32
      %44 = vector.broadcast %cst_26 : f32 to vector<16x1xf32>
      %45 = arith.addf %41, %44 : vector<16x1xf32>
      %46 = math.rsqrt %45 : vector<16x1xf32>
      %47 = vector.broadcast %46 : vector<16x1xf32> to vector<16x32xf32>
      %48 = arith.mulf %43, %47 : vector<16x32xf32>
      %c0_27 = arith.constant 0 : index
      %c0_28 = arith.constant 0 : index
      %49 = vector.load %arg8[%c0_27, %c0_28] : memref<1x32xbf16, #tpu.memory_space<vmem>>, vector<1x32xbf16>
      %50 = arith.extf %49 : vector<1x32xbf16> to vector<1x32xf32>
      %51 = vector.broadcast %50 : vector<1x32xf32> to vector<16x32xf32>
      %52 = arith.mulf %48, %51 : vector<16x32xf32>
      %c0_29 = arith.constant 0 : index
      %c0_30 = arith.constant 0 : index
      %53 = vector.load %arg9[%c0_29, %c0_30] : memref<1x32xbf16, #tpu.memory_space<vmem>>, vector<1x32xbf16>
      %54 = arith.extf %53 : vector<1x32xbf16> to vector<1x32xf32>
      %55 = vector.broadcast %54 : vector<1x32xf32> to vector<16x32xf32>
      %56 = arith.addf %52, %55 : vector<16x32xf32>
      %57 = arith.truncf %56 : vector<16x32xf32> to vector<16x32xbf16>
      %c0_31 = arith.constant 0 : index
      %c0_32 = arith.constant 0 : index
      %58 = vector.load %arg10[%c0_31, %c0_32] : memref<16x32xbf16, #tpu.memory_space<vmem>>, vector<16x32xbf16>
      tpu.vector_store %arg10[%c0_31, %c0_32], %57 {strides = array<i32>} : memref<16x32xbf16, #tpu.memory_space<vmem>>, vector<16x32xbf16>,
    } else {
    }
    return
  }
  func.func @transform_0(%arg0: i32, %arg1: i32) -> (i32, i32) {
    %c0_i32 = arith.constant 0 : i32
    %c0_i32_0 = arith.constant 0 : i32
    return %arg0, %c0_i32 : i32, i32
  }
  func.func @transform_1(%arg0: i32, %arg1: i32) -> (i32, i32) {
    %c0_i32 = arith.constant 0 : i32
    %c0_i32_0 = arith.constant 0 : i32
    return %c0_i32, %arg1 : i32, i32
  }
  func.func @transform_2(%arg0: i32, %arg1: i32) -> (i32, i32) {
    %c0_i32 = arith.constant 0 : i32
    %c0_i32_0 = arith.constant 0 : i32
    return %c0_i32, %arg1 : i32, i32
  }
  func.func @transform_3(%arg0: i32, %arg1: i32) -> (i32, i32) {
    %c0_i32 = arith.constant 0 : i32
    %c0_i32_0 = arith.constant 0 : i32
    return %arg1, %c0_i32 : i32, i32
  }
  func.func @transform_4(%arg0: i32, %arg1: i32) -> (i32, i32) {
    %c0_i32 = arith.constant 0 : i32
    %c0_i32_0 = arith.constant 0 : i32
    %c0_i32_1 = arith.constant 0 : i32
    return %c0_i32, %c0_i32_0 : i32, i32
  }
  func.func @transform_5(%arg0: i32, %arg1: i32) -> (i32, i32) {
    %c0_i32 = arith.constant 0 : i32
    %c0_i32_0 = arith.constant 0 : i32
    return %arg0, %c0_i32 : i32, i32
  }
  func.func @transform_6(%arg0: i32, %arg1: i32) -> (i32, i32) {
    %c0_i32 = arith.constant 0 : i32
    %c0_i32_0 = arith.constant 0 : i32
    %c0_i32_1 = arith.constant 0 : i32
    return %c0_i32, %c0_i32_0 : i32, i32
  }
  func.func @transform_7(%arg0: i32, %arg1: i32) -> (i32, i32) {
    %c0_i32 = arith.constant 0 : i32
    %c0_i32_0 = arith.constant 0 : i32
    %c0_i32_1 = arith.constant 0 : i32
    return %c0_i32, %c0_i32_0 : i32, i32
  }
  func.func @transform_8(%arg0: i32, %arg1: i32) -> (i32, i32) {
    %c0_i32 = arith.constant 0 : i32
    %c0_i32_0 = arith.constant 0 : i32
    return %arg0, %c0_i32 : i32, i32
  }
}

</mosaic_0001>

<bundles_post_ra>
// kernel: transformer_forward.10
= control target key start
LH: loop header
LB: loop body
LE: loop exit
PB: predicated region body
PF: predicated region fallthrough
CT: control target
= control target key end

     0   :  { %vm28_vm0 = vcmask 261120   ;;  %v214_v0 = vmov 0.0   ;;  %vm215_vm1 = vmmov 0   ;;  %v112_v4 = vlaneseq  ;;  %s287_s1 = inlined_call_operand.vmem [shape: bf16[32,32], index: 1, kind: input, shape index: {}]   ;;  %s288_s0 = inlined_call_operand.vmem [shape: bf16[16,32], index: 0, kind: input, shape index: {}]   ;;  %s289_s2 = inlined_call_operand.vmem [shape: bf16[1,32], index: 2, kind: input, shape index: {}]   ;;  %s290_s3 = inlined_call_operand.vmem [shape: bf16[16,32], index: 3, kind: input, shape index: {}]   ;;  %s291_s4 = inlined_call_operand.vmem [shape: bf16[1,32], index: 4, kind: input, shape index: {}]   ;;  %s292_s5 = inlined_call_operand.vmem [shape: bf16[1,32], index: 5, kind: input, shape index: {}]   ;;  %s293_s6 = inlined_call_operand.vmem [shape: bf16[16,32], index: 6, kind: output, shape index: {}]  }
   0x1   :  { %197 = vmatprep.subr.bf16.mxu0 %v214_v0  ;;  %v207_v1 = vld [vmem:[%s287_s1 + $0x8] sm:$0xff]   ;;  %201 = vmatprep.mubr.msk.bf16.mxu0 %vm215_vm1, %v214_v0  ;;  %29 = vst.msk [vmem:[#allocation2] sm:$0xff] %vm28_vm0, %v214_v0  ;;  %30 = vst.msk [vmem:[#allocation2 + $0x8] sm:$0xff] %vm28_vm0, %v214_v0  ;;  %v208_v2 = vld [vmem:[%s287_s1] sm:$0xff]   ;;  %vm175_vm2 = vcmask 257024  }
   0x2   :  { %198 = vmatpush3.bf16.msra.mxu0 %v207_v1  ;;  %v209_v3 = vld [vmem:[%s288_s0] sm:$0xff]   ;;  %v113_v6 = vshrl.u32 %v112_v4, 7 }
   0x3   :  { %199 = vmatprep.subr.bf16.mxu0 %v214_v0  ;;  %v110_v8 = vld [vmem:[%s289_s2] sm:$0x1] }
   0x4   :  { %v111_v12 = vunpack.c.l.bf16 %v110_v8  ;;  %v114_v13 = vsub.s32 0, %v113_v6  ;;  %v191_v17 = vld [vmem:[%s290_s3] sm:$0xff]  }
   0x5   :  { %v192_v19 = vunpack.c.l.bf16 %v191_v17  ;;  %v193_v23 = vunpack.c.h.bf16 %v191_v17  ;;  %v151_v45 = vld [vmem:[%s291_s4] sm:$0x1] }
   0x6   :  { %200 = vmatpush3.bf16.msra.mxu0 %v208_v2  ;;  %v115_v18 = vrot.slane %v111_v12, %v114_v13  ;;  %v159_v46 = vld [vmem:[%s292_s5] sm:$0x1]  ;;  %v152_v47 = vunpack.c.l.bf16 %v151_v45 }
   0x7   :  { %v160_v48 = vunpack.c.l.bf16 %v159_v46 }
   0x8   :  { %v31_v5 = vld [vmem:[#allocation2] sm:$0xff]  ;;  %v32_v11 = vld [vmem:[#allocation2 + $0x8] sm:$0xff]  ;;  %v156_v49 = vrot.slane %v152_v47, %v114_v13 }
   0x9   :  { %202 = vmatmul.mubr.msk.bf16.vlgmr.msra.gmra.mxu0 %vm28_vm0, %v209_v3  ;;  %v164_v51 = vrot.slane %v160_v48, %v114_v13 }
  0xc9   :  { %v94_v7 = vpop.f32.mrf.mxu0 }
  0xca   :  { %v101_v9 = vadd.f32 %v94_v7, %v31_v5 }
  0xcb   :  { %v203_v10 = vpop.f32.mrf.mxu0 }
  0xcc   :  { %103 = vst.msk [vmem:[#allocation2] sm:$0xff] %vm28_vm0, %v101_v9 }
  0xcd   :  { %v97_v14 = vpop.f32.mrf.mxu0 }
  0xce   :  { %v102_v15 = vadd.f32 %v97_v14, %v32_v11 }
  0xcf   :  { %v204_v16 = vpop.f32.mrf.mxu0 }
  0xd0   :  { %104 = vst.msk [vmem:[#allocation2 + $0x8] sm:$0xff] %vm28_vm0, %v102_v15 }
  0xd3   :  { %v108_v20 = vld [vmem:[#allocation2] sm:$0xff] }
  0xd4   :  { %v116_v21 = vadd.f32 %v115_v18, %v108_v20 }
  0xd6   :  { %v122_v22 = vadd.f32 %v192_v19, %v116_v21 }
  0xd7   :  { %v109_v24 = vld [vmem:[#allocation2 + $0x8] sm:$0xff] }
  0xd8   :  { %v124_v25 = vsel %vm28_vm0, %v122_v22, 0.0  ;;  %v117_v26 = vadd.f32 %v115_v18, %v109_v24 }
  0xd9   :  { %125 = vadd.xlane.f32.xlu0 %v124_v25 }
  0xda   :  { %v123_v27 = vadd.f32 %v193_v23, %v117_v26 }
  0xdc   :  { %v127_v28 = vsel %vm28_vm0, %v123_v27, 0.0 }
  0xdd   :  { %128 = vadd.xlane.f32.xlu0 %v127_v28 }
 0x162   :  { %v126_v29 = vpop.xlane.xlu0 %125 }
 0x163   :  { %v131_v30 = vmul.f32 0.03125, %v126_v29 }
 0x165   :  { %v133_v31 = vsub.f32 %v122_v22, %v131_v30 }
 0x166   :  { %v129_v32 = vpop.xlane.xlu0 %128 }
 0x167   :  { %v132_v33 = vmul.f32 0.03125, %v129_v32  ;;  %v135_v34 = vmul.f32 %v133_v31, %v133_v31 }
 0x169   :  { %v134_v35 = vsub.f32 %v123_v27, %v132_v33  ;;  %v137_v36 = vsel %vm28_vm0, %v135_v34, 0.0 }
 0x16a   :  { %138 = vadd.xlane.f32.xlu1 %v137_v36 }
 0x16b   :  { %v136_v37 = vmul.f32 %v134_v35, %v134_v35 }
 0x16d   :  { %v140_v38 = vsel %vm28_vm0, %v136_v37, 0.0 }
 0x16e   :  { %141 = vadd.xlane.f32.xlu1 %v140_v38 }
 0x1f3   :  { %v139_v39 = vpop.xlane.xlu1 %138 }
 0x1f4   :  { %v143_v40 = vmul.f32 0.03125, %v139_v39 }
 0x1f6   :  { %v145_v41 = vadd.f32 1e-05, %v143_v40 }
 0x1f7   :  { %v142_v42 = vpop.xlane.xlu1 %141 }
 0x1f8   :  { %210 = vrsqrt.f32 %v145_v41  ;;  %v144_v43 = vmul.f32 0.03125, %v142_v42 }
 0x1fa   :  { %v146_v44 = vadd.f32 1e-05, %v144_v43 }
 0x1fc   :  { %212 = vrsqrt.f32 %v146_v44 }
 0x205   :  { %v211_v50 = vpop.eup %210 }
 0x206   :  { %v149_v52 = vmul.f32 %v211_v50, %v133_v31 }
 0x208   :  { %v157_v53 = vmul.f32 %v156_v49, %v149_v52 }
 0x209   :  { %v213_v54 = vpop.eup %212 }
 0x20a   :  { %v165_v55 = vadd.f32 %v164_v51, %v157_v53  ;;  %v150_v56 = vmul.f32 %v213_v54, %v134_v35 }
 0x20c   :  { %v188_v57 = vpack.c.bf16 %v165_v55, %v165_v55  ;;  %v158_v58 = vmul.f32 %v156_v49, %v150_v56 }
 0x20e   :  { %176 = vst.msk [vmem:[%s293_s6] sm:$0xf] %vm175_vm2, %v188_v57  ;;  %v166_v59 = vadd.f32 %v164_v51, %v158_v58 }
 0x210   :  { %v189_v60 = vpack.c.bf16 %v166_v59, %v166_v59 }
 0x212   :  { %177 = vst.msk [vmem:[%s293_s6 + $0x4] sm:$0xf] %vm175_vm2, %v189_v60 }

// kernel: transformer_forward.8
= control target key start
LH: loop header
LB: loop body
LE: loop exit
PB: predicated region body
PF: predicated region fallthrough
CT: control target
= control target key end

     0   :  { %vm19_vm0 = vcmask 785408   ;;  %v149_v0 = vmov 0.0   ;;  %vm150_vm1 = vmmov 0   ;;  %vm47_vm2 = vcmask 261120   ;;  %s193_s1 = inlined_call_operand.vmem [shape: bf16[32,96], index: 1, kind: input, shape index: {}]   ;;  %s194_s0 = inlined_call_operand.vmem [shape: bf16[16,32], index: 0, kind: input, shape index: {}]   ;;  %s195_s2 = inlined_call_operand.vmem [shape: bf16[1,96], index: 2, kind: input, shape index: {}]   ;;  %s196_s3 = inlined_call_operand.vmem [shape: bf16[16,96], index: 3, kind: output, shape index: {}]  }
   0x1   :  { %136 = vmatprep.subr.bf16.mxu0 %v149_v0  ;;  %v146_v1 = vld [vmem:[%s193_s1 + $0x8] sm:$0xff]   ;;  %140 = vmatprep.mubr.msk.bf16.mxu0 %vm150_vm1, %v149_v0  ;;  %20 = vst.msk [vmem:[#allocation2] sm:$0xff] %vm19_vm0, %v149_v0  ;;  %21 = vst.msk [vmem:[#allocation2 + $0x8] sm:$0xff] %vm19_vm0, %v149_v0  ;;  %v147_v2 = vld [vmem:[%s193_s1] sm:$0xff]   ;;  %v104_v4 = vlaneseq  ;;  %vm118_vm3 = vcmask 781312  }
   0x2   :  { %137 = vmatpush3.bf16.msra.mxu0 %v146_v1  ;;  %v148_v3 = vld [vmem:[%s194_s0] sm:$0xff]  }
   0x3   :  { %138 = vmatprep.subr.bf16.mxu0 %v149_v0  ;;  %v105_v6 = vshrl.u32 %v104_v4, 7  ;;  %v102_v8 = vld [vmem:[%s195_s2] sm:$0x1] }
   0x4   :  { %v103_v12 = vunpack.c.l.bf16 %v102_v8 }
   0x5   :  { %v106_v13 = vsub.s32 0, %v105_v6 }
   0x6   :  { %139 = vmatpush3.bf16.msra.mxu0 %v147_v2 }
   0x7   :  { %v107_v17 = vrot.slane %v103_v12, %v106_v13 }
   0x8   :  { %v22_v5 = vld [vmem:[#allocation2] sm:$0xff]  ;;  %v23_v11 = vld [vmem:[#allocation2 + $0x8] sm:$0xff] }
   0x9   :  { %141 = vmatmul.mubr.msk.bf16.vlgmr.msra.gmra.mxu0 %vm47_vm2, %v148_v3 }
  0xc9   :  { %v85_v7 = vpop.f32.mrf.mxu0 }
  0xca   :  { %v92_v9 = vadd.f32 %v85_v7, %v22_v5 }
  0xcb   :  { %v142_v10 = vpop.f32.mrf.mxu0 }
  0xcc   :  { %95 = vst.msk [vmem:[#allocation2] sm:$0xff] %vm19_vm0, %v92_v9 }
  0xcd   :  { %v88_v14 = vpop.f32.mrf.mxu0 }
  0xce   :  { %v93_v15 = vadd.f32 %v88_v14, %v23_v11 }
  0xcf   :  { %v143_v16 = vpop.f32.mrf.mxu0 }
  0xd0   :  { %96 = vst.msk [vmem:[#allocation2 + $0x8] sm:$0xff] %vm19_vm0, %v93_v15 }
  0xd3   :  { %v100_v18 = vld [vmem:[#allocation2] sm:$0xff] }
  0xd4   :  { %v108_v19 = vadd.f32 %v107_v17, %v100_v18 }
  0xd6   :  { %v131_v20 = vpack.c.bf16 %v108_v19, %v108_v19 }
  0xd7   :  { %v101_v21 = vld [vmem:[#allocation2 + $0x8] sm:$0xff] }
  0xd8   :  { %119 = vst.msk [vmem:[%s196_s3] sm:$0xf] %vm118_vm3, %v131_v20  ;;  %v109_v22 = vadd.f32 %v107_v17, %v101_v21 }
  0xda   :  { %v132_v23 = vpack.c.bf16 %v109_v22, %v109_v22 }
  0xdc   :  { %120 = vst.msk [vmem:[%s196_s3 + $0x4] sm:$0xf] %vm118_vm3, %v132_v23 }

// kernel: transformer_forward.9
= control target key start
LH: loop header
LB: loop body
LE: loop exit
PB: predicated region body
PF: predicated region fallthrough
CT: control target
= control target key end

     0   :  { %s807_s6 = smov 0   ;;  %s898_s0 = inlined_call_operand.vmem [shape: bf16[2,8,96], index: 0, kind: input, shape index: {}]   ;;  %s899_s1 = inlined_call_operand.vmem [shape: bf16[2,8,32], index: 1, kind: output, shape index: {}]  }
   0x1 LB: > { %s644_s7 = sadd.s32 4294967295, %s779_s6   ;;  %p648_p0 = scmp.ge.s32.totalorder %s779_s6, 1  ;;  %s779_s6 = sphi %s807_s6, %s11_s6  }
   0x2   : > { %p86_p1 = scmp.lt.s32.totalorder %s779_s6, 3 }
   0x4   : > { %p87_p2 = pnand %p648_p0, %p86_p1 }
   0x5   : > { %p104_p3 = scmp.lt.s32.totalorder (!%p87_p2), %s644_s7, 1  ;;  %s783_s12 = smov (!%p87_p2), 96  }
   0x6   : > { %90 = sbr.rel (%p87_p2) target bundleno = 1538 (0x602), region = 24  ;;  %s784_s13 = smov (!%p87_p2), 64  }
   0x7   : > { %s785_s14 = smov (!%p87_p2), 88   ;;  %s786_s15 = smov (!%p87_p2), 72  }
   0x8   : > { %s787_s16 = smov (!%p87_p2), 120   ;;  %s788_s17 = smov (!%p87_p2), 80  }
   0x9   : > { %s789_s18 = smov (!%p87_p2), 112   ;;  %s790_s19 = smov (!%p87_p2), 104  }
   0xa   : > { %s791_s23 = smov (!%p87_p2), 56   ;;  %s792_s24 = smov (!%p87_p2), 48  }
   0xb   : > { %v781_v0 = vmov 0.0   ;;  %vm782_vm0 = vmmov 0   ;;  %s901_s7 = smov (!%p104_p3, %s644_s7), 1  ;;  %vm119_vm1 = vcmask 64512   ;;  %vm184_vm2 = vcmask 1043456   ;;  %s793_s25 = smov 40  }
   0xc   : > { %684 = vmatprep.subr.bf16.mxu0 %v781_v0  ;;  %686 = vmatprep.mubr.msk.bf16.mxu0 %vm782_vm0, %v781_v0  ;;  %s649_s8 = sshll.u32 %s901_s7, 2  ;;  %vm229_vm3 = vcmask 60416   ;;  %s794_s26 = smov 8   ;;  %vm349_vm4 = vcmask 126016   ;;  %vm469_vm5 = vcmask 191616   ;;  %vm589_vm6 = vcmask 257216  }
   0xd   : > { %690 = vmatprep.subr.bf16.mxu1 %v781_v0  ;;  %692 = vmatprep.mubr.msk.bf16.mxu1 %vm782_vm0, %v781_v0  ;;  %s107_s11 = scalar_lea.vmem %s898_s0, %s649_s8  ;;  %s868_s22 = scalar_lea.vmem %s899_s1, %s649_s8 }
   0xe   : > { %v113_v1 = vld [vmem:[%s107_s11] sm:$0xf]  ;;  %s795_s27 = smov 16   ;;  %s796_s28 = smov 24  }
   0xf   : > { %v829_v2 = vcombine.low %v113_v1, %v113_v1 }
  0x11   : > { %117 = vrot.lane.b32.xlu0 %v829_v2, %s783_s12  ;;  %179 = vrot.lane.b32.xlu1 %v829_v2, %s784_s13 }
  0x15   : > { %233 = vrot.lane.b32.xlu1 %v829_v2, %s785_s14 }
  0x83   : > { %v118_v3 = vpop.permute.xlu0 %117  ;;  %v180_v11 = vpop.permute.xlu1 %179 }
  0x84   : > { %v124_v4 = vsel %vm119_vm1, %v118_v3, 0  ;;  %v186_v12 = vsel %vm184_vm2, %v180_v11, 0 }
  0x85   : > { %685 = vmatpush3.bf16.xpose.msra.mxu0 %v124_v4  ;;  %691 = vmatpush3.bf16.msra.mxu1 %v186_v12 }
  0x86   : > { %702 = vmatprep.subr.bf16.mxu0 %v781_v0  ;;  %696 = vmatprep.subr.bf16.mxu1 %v781_v0 }
  0x87   : > { %v234_v18 = vpop.permute.xlu1 %233 }
  0x88   : > { %v239_v24 = vsel %vm119_vm1, %v234_v18, 0 }
  0x8c   : > { %687 = vmatmul.mubr.msk.bf16.vlgmr.msra.gmra.mxu0 %vm119_vm1, %v113_v1 }
  0x8d   : > { %704 = vmatprep.mubr.msk.bf16.mxu0 %vm782_vm0, %v781_v0 }
 0x14c   : > { %v160_v5 = vpop.f32.mrf.mxu0 }
 0x14d   : > { %v166_v6 = vmul.f32 0.35355338, %v160_v5 }
 0x14e   : > { %v688_v7 = vpop.f32.mrf.mxu0 }
 0x14f   : > { %v167_v8 = vsel %vm119_vm1, %v166_v6, -inf }
 0x150   : > { %168 = vmax.xlane.f32.xlu0 %v167_v8  ;;  %v163_v9 = vpop.f32.mrf.mxu0 }
 0x152   : > { %v689_v10 = vpop.f32.mrf.mxu0 }
 0x166   : > { %473 = vrot.lane.b32.xlu0 %v829_v2, %s786_s15 }
 0x1d9   : > { %v169_v13 = vpop.xlane.xlu0 %168 }
 0x1da   : > { %v170_v14 = vsub.f32 %v166_v6, %v169_v13 }
 0x1dc   : > { %v171_v15 = vmul.f32 1.442695, %v170_v14 }
 0x1dd   : > { %v474_v27 = vpop.permute.xlu0 %473 }
 0x1de   : > { %757 = vpow2.f32 %v171_v15  ;;  %v479_v29 = vsel %vm119_vm1, %v474_v27, 0 }
 0x1eb   : > { %v758_v16 = vpop.eup %757 }
 0x1ec   : > { %v173_v17 = vsel %vm119_vm1, %v758_v16, 0.0 }
 0x1ed   : > { %174 = vadd.xlane.f32.xlu1 %v173_v17 }
 0x1fe   : > { %231 = vrot.lane.b32.xlu1 %v829_v2, %s787_s16 }
 0x202   : > { %353 = vrot.lane.b32.xlu1 %v829_v2, %s788_s17 }
 0x206   : > { %351 = vrot.lane.b32.xlu1 %v829_v2, %s789_s18 }
 0x20a   : > { %471 = vrot.lane.b32.xlu1 %v829_v2, %s790_s19 }
 0x276   : > { %v175_v19 = vpop.xlane.xlu1 %174 }
 0x277   : > { %759 = vrcp.f32 %v175_v19 }
 0x27a   : > { %v232_v22 = vpop.permute.xlu1 %231 }
 0x27e   : > { %v354_v25 = vpop.permute.xlu1 %353 }
 0x27f   : > { %v359_v26 = vsel %vm119_vm1, %v354_v25, 0 }
 0x282   : > { %v352_v28 = vpop.permute.xlu1 %351 }
 0x284   : > { %v760_v20 = vpop.eup %759 }
 0x285   : > { %v177_v21 = vmul.f32 %v760_v20, %v758_v16 }
 0x286   : > { %v472_v30 = vpop.permute.xlu1 %471 }
 0x287   : > { %v178_v23 = vpack.c.bf16 %v177_v21, %v177_v21 }
 0x289   : > { %693 = vmatmul.mubr.msk.bf16.vlgmr.msra.gmra.mxu1 %vm119_vm1, %v178_v23 }
 0x28a   : > { %697 = vmatpush3.bf16.xpose.msra.mxu1 %v239_v24  ;;  %698 = vmatprep.mubr.msk.bf16.mxu1 %vm782_vm0, %v781_v0 }
 0x28b   : > { %708 = vmatprep.subr.bf16.mxu1 %v781_v0 }
 0x291   : > { %699 = vmatmul.mubr.msk.bf16.vlgmr.msra.gmra.mxu1 %vm119_vm1, %v232_v22 }
 0x292   : > { %709 = vmatpush3.bf16.xpose.msra.mxu1 %v359_v26  ;;  %710 = vmatprep.mubr.msk.bf16.mxu1 %vm782_vm0, %v781_v0 }
 0x293   : > { %720 = vmatprep.subr.bf16.mxu1 %v781_v0 }
 0x299   : > { %711 = vmatmul.mubr.msk.bf16.vlgmr.msra.gmra.mxu1 %vm119_vm1, %v352_v28 }
 0x29a   : > { %721 = vmatpush3.bf16.xpose.msra.mxu1 %v479_v29  ;;  %722 = vmatprep.mubr.msk.bf16.mxu1 %vm782_vm0, %v781_v0 }
 0x2a1   : > { %723 = vmatmul.mubr.msk.bf16.vlgmr.msra.gmra.mxu1 %vm119_vm1, %v472_v30 }
 0x349   : > { %v222_v31 = vpop.f32.mrf.mxu1 }
 0x34a   : > { %v228_v32 = vpack.c.bf16 %v222_v31, %v222_v31 }
 0x34b   : > { %v694_v33 = vpop.f32.mrf.mxu1 }
 0x34c   : > { %230 = vst.msk [vmem:[%s868_s22] sm:$0xf] %vm229_vm3, %v228_v32 }
 0x34d   : > { %v225_v34 = vpop.f32.mrf.mxu1 }
 0x34f   : > { %v695_v35 = vpop.f32.mrf.mxu1 }
 0x351   : > { %v275_v36 = vpop.f32.mrf.mxu1 }
 0x352   : > { %v281_v37 = vmul.f32 0.35355338, %v275_v36 }
 0x353   : > { %v700_v38 = vpop.f32.mrf.mxu1 }
 0x354   : > { %v282_v39 = vsel %vm119_vm1, %v281_v37, -inf }
 0x355   : > { %283 = vmax.xlane.f32.xlu1 %v282_v39  ;;  %v278_v40 = vpop.f32.mrf.mxu1 }
 0x357   : > { %v701_v41 = vpop.f32.mrf.mxu1 }
 0x359   : > { %v395_v42 = vpop.f32.mrf.mxu1 }
 0x35a   : > { %v401_v43 = vmul.f32 0.35355338, %v395_v42 }
 0x35b   : > { %v712_v44 = vpop.f32.mrf.mxu1 }
 0x35c   : > { %v402_v45 = vsel %vm119_vm1, %v401_v43, -inf }
 0x35d   : > { %403 = vmax.xlane.f32.xlu0 %v402_v45  ;;  %v398_v46 = vpop.f32.mrf.mxu1 }
 0x35f   : > { %v713_v47 = vpop.f32.mrf.mxu1 }
 0x361   : > { %v515_v48 = vpop.f32.mrf.mxu1 }
 0x362   : > { %v521_v49 = vmul.f32 0.35355338, %v515_v48 }
 0x363   : > { %v724_v50 = vpop.f32.mrf.mxu1 }
 0x364   : > { %v522_v51 = vsel %vm119_vm1, %v521_v49, -inf }
 0x365   : > { %523 = vmax.xlane.f32.xlu1 %v522_v51  ;;  %v518_v52 = vpop.f32.mrf.mxu1 }
 0x367   : > { %v725_v53 = vpop.f32.mrf.mxu1 }
 0x3de   : > { %v284_v54 = vpop.xlane.xlu1 %283 }
 0x3df   : > { %v285_v55 = vsub.f32 %v281_v37, %v284_v54 }
 0x3e1   : > { %v286_v56 = vmul.f32 1.442695, %v285_v55 }
 0x3e3   : > { %761 = vpow2.f32 %v286_v56 }
 0x3e6   : > { %v404_v1 = vpop.xlane.xlu0 %403 }
 0x3e7   : > { %v405_v3 = vsub.f32 %v401_v43, %v404_v1 }
 0x3e9   : > { %v406_v4 = vmul.f32 1.442695, %v405_v3 }
 0x3ee   : > { %v524_v57 = vpop.xlane.xlu1 %523 }
 0x3ef   : > { %v525_v58 = vsub.f32 %v521_v49, %v524_v57 }
 0x3f0   : > { %v762_v59 = vpop.eup %761 }
 0x3f1   : > { %v526_v60 = vmul.f32 1.442695, %v525_v58  ;;  %v288_v61 = vsel %vm119_vm1, %v762_v59, 0.0 }
 0x3f2   : > { %289 = vadd.xlane.f32.xlu1 %v288_v61 }
 0x3f3   : > { %763 = vpow2.f32 %v526_v60 }
 0x3f4   : > { %765 = vpow2.f32 %v406_v4 }
 0x400   : > { %v764_v62 = vpop.eup %763 }
 0x401   : > { %v528_v63 = vsel %vm119_vm1, %v764_v62, 0.0  ;;  %v766_v5 = vpop.eup %765 }
 0x402   : > { %529 = vadd.xlane.f32.xlu0 %v528_v63  ;;  %v408_v6 = vsel %vm119_vm1, %v766_v5, 0.0 }
 0x403   : > { %294 = vrot.lane.b32.xlu1 %v829_v2, %s791_s23 }
 0x418   : > { %414 = vrot.lane.b32.xlu0 %v829_v2, %s792_s24 }
 0x427   : > { %409 = vadd.xlane.f32.xlu1 %v408_v6 }
 0x438   : > { %534 = vrot.lane.b32.xlu1 %v829_v2, %s793_s25 }
 0x47b   : > { %v290_v7 = vpop.xlane.xlu1 %289 }
 0x47c   : > { %767 = vrcp.f32 %v290_v7 }
 0x47f   : > { %v295_v8 = vpop.permute.xlu1 %294 }
 0x480   : > { %v300_v9 = vsel %vm184_vm2, %v295_v8, 0 }
 0x481   : > { %703 = vmatpush3.bf16.msra.mxu0 %v300_v9 }
 0x482   : > { %714 = vmatprep.subr.bf16.mxu0 %v781_v0 }
 0x489   : > { %v768_v10 = vpop.eup %767 }
 0x48a   : > { %v292_v11 = vmul.f32 %v768_v10, %v762_v59 }
 0x48b   : > { %v530_v12 = vpop.xlane.xlu0 %529 }
 0x48c   : > { %v293_v13 = vpack.c.bf16 %v292_v11, %v292_v11 }
 0x48e   : > { %705 = vmatmul.mubr.msk.bf16.vlgmr.msra.gmra.mxu0 %vm119_vm1, %v293_v13 }
 0x48f   : > { %v415_v14 = vpop.permute.xlu0 %414  ;;  %716 = vmatprep.mubr.msk.bf16.mxu0 %vm782_vm0, %v781_v0 }
 0x490   : > { %v420_v2 = vsel %vm184_vm2, %v415_v14, 0 }
 0x491   : > { %715 = vmatpush3.bf16.msra.mxu0 %v420_v2 }
 0x492   : > { %726 = vmatprep.subr.bf16.mxu0 %v781_v0 }
 0x4b0   : > { %v410_v15 = vpop.xlane.xlu1 %409 }
 0x4b1   : > { %769 = vrcp.f32 %v410_v15 }
 0x4b2   : > { %771 = vrcp.f32 %v530_v12 }
 0x4b4   : > { %v535_v17 = vpop.permute.xlu1 %534 }
 0x4b5   : > { %v540_v19 = vsel %vm184_vm2, %v535_v17, 0 }
 0x4be   : > { %v770_v16 = vpop.eup %769 }
 0x4bf   : > { %v412_v18 = vmul.f32 %v770_v16, %v766_v5  ;;  %v772_v21 = vpop.eup %771 }
 0x4c0   : > { %v532_v22 = vmul.f32 %v772_v21, %v764_v62 }
 0x4c1   : > { %v413_v20 = vpack.c.bf16 %v412_v18, %v412_v18 }
 0x4c2   : > { %v533_v23 = vpack.c.bf16 %v532_v22, %v532_v22 }
 0x4c3   : > { %717 = vmatmul.mubr.msk.bf16.vlgmr.msra.gmra.mxu0 %vm119_vm1, %v413_v20 }
 0x4c4   : > { %727 = vmatpush3.bf16.msra.mxu0 %v540_v19  ;;  %728 = vmatprep.mubr.msk.bf16.mxu0 %vm782_vm0, %v781_v0 }
 0x4cb   : > { %729 = vmatmul.mubr.msk.bf16.vlgmr.msra.gmra.mxu0 %vm119_vm1, %v533_v23 }
 0x54e   : > { %v336_v24 = vpop.f32.mrf.mxu0 }
 0x54f   : > { %v665_v25 = vpack.c.bf16 %v336_v24, %v336_v24 }
 0x550   : > { %v706_v26 = vpop.f32.mrf.mxu0 }
 0x551   : > { %346 = vrot.lane.b32.xlu1 %v665_v25, %s794_s26 }
 0x552   : > { %v339_v27 = vpop.f32.mrf.mxu0 }
 0x554   : > { %v707_v28 = vpop.f32.mrf.mxu0 }
 0x583   : > { %v456_v29 = vpop.f32.mrf.mxu0 }
 0x584   : > { %v666_v30 = vpack.c.bf16 %v456_v29, %v456_v29 }
 0x585   : > { %v718_v31 = vpop.f32.mrf.mxu0 }
 0x586   : > { %466 = vrot.lane.b32.xlu0 %v666_v30, %s795_s27 }
 0x587   : > { %v459_v32 = vpop.f32.mrf.mxu0 }
 0x589   : > { %v719_v0 = vpop.f32.mrf.mxu0 }
 0x58b   : > { %v576_v33 = vpop.f32.mrf.mxu0 }
 0x58c   : > { %v667_v34 = vpack.c.bf16 %v576_v33, %v576_v33 }
 0x58d   : > { %v730_v35 = vpop.f32.mrf.mxu0 }
 0x58e   : > { %586 = vrot.lane.b32.xlu1 %v667_v34, %s796_s28 }
 0x58f   : > { %v579_v36 = vpop.f32.mrf.mxu0 }
 0x591   : > { %v731_v37 = vpop.f32.mrf.mxu0 }
 0x5c3   : > { %v347_v38 = vpop.permute.xlu1 %346 }
 0x5c4   : > { %350 = vst.msk [vmem:[%s868_s22] sm:$0xf] %vm349_vm4, %v347_v38 }
 0x5f8   : > { %v467_v39 = vpop.permute.xlu0 %466 }
 0x5f9   : > { %470 = vst.msk [vmem:[%s868_s22] sm:$0xf] %vm469_vm5, %v467_v39 }
 0x600   : > { %v587_v40 = vpop.permute.xlu1 %586 }
 0x601   : > { %590 = vst.msk [vmem:[%s868_s22] sm:$0xf] %vm589_vm6, %v587_v40 }
 0x602 PF: > { %s11_s6 = sadd.s32 1, %s779_s6  }
 0x603   : > { %p8_p4 = scmp.ge.s32.totalorder %s11_s6, 4  }
 0x605   :  { %10 = sbr.rel (!%p8_p4) target bundleno = 1 (0x1), region = 54 }

// kernel: transformer_forward.11
= control target key start
LH: loop header
LB: loop body
LE: loop exit
PB: predicated region body
PF: predicated region fallthrough
CT: control target
= control target key end

     0   :  { %vm34_vm0 = vcmask 261120   ;;  %v332_v0 = vmov 0.0   ;;  %vm333_vm1 = vmmov 0   ;;  %v45_v8 = vlaneseq  ;;  %s436_s1 = inlined_call_operand.vmem [shape: bf16[32,64], index: 1, kind: input, shape index: {}]   ;;  %s437_s3 = inlined_call_operand.vmem [shape: bf16[64,32], index: 3, kind: input, shape index: {}]   ;;  %s438_s0 = inlined_call_operand.vmem [shape: bf16[16,32], index: 0, kind: input, shape index: {}, may-alias: {0,5}]   ;;  %s439_s2 = inlined_call_operand.vmem [shape: bf16[1,64], index: 2, kind: input, shape index: {}]   ;;  %s440_s4 = inlined_call_operand.vmem [shape: bf16[1,32], index: 4, kind: input, shape index: {}]   ;;  %s441_s5 = inlined_call_operand.vmem [shape: bf16[16,32], index: 5, kind: input, shape index: {}, may-alias: {0,5}]   ;;  %s442_s6 = inlined_call_operand.vmem [shape: bf16[1,32], index: 6, kind: input, shape index: {}]   ;;  %s443_s7 = inlined_call_operand.vmem [shape: bf16[1,32], index: 7, kind: input, shape index: {}]   ;;  %s444_s8 = inlined_call_operand.vmem [shape: bf16[16,32], index: 8, kind: output, shape index: {}]  }
   0x1   :  { %299 = vmatprep.subr.bf16.mxu0 %v332_v0  ;;  %v321_v1 = vld [vmem:[%s436_s1 + $0x8] sm:$0xff]   ;;  %303 = vmatprep.mubr.msk.bf16.mxu0 %vm333_vm1, %v332_v0  ;;  %35 = vst.msk [vmem:[#allocation2] sm:$0xff] %vm34_vm0, %v332_v0  ;;  %36 = vst.msk [vmem:[#allocation2 + $0x8] sm:$0xff] %vm34_vm0, %v332_v0  ;;  %v322_v2 = vld [vmem:[%s436_s1] sm:$0xff]   ;;  %vm148_vm2 = vcmask 523264   ;;  %vm267_vm3 = vcmask 257024  }
   0x2   :  { %307 = vmatprep.subr.bf16.mxu1 %v332_v0  ;;  %315 = vmatprep.mubr.msk.bf16.mxu1 %vm333_vm1, %v332_v0  ;;  %v324_v3 = vld [vmem:[%s437_s3 + $0x18] sm:$0xff]   ;;  %v323_v4 = vld [vmem:[%s438_s0] sm:$0xff]   ;;  %v325_v5 = vld [vmem:[%s437_s3 + $0x10] sm:$0xff]   ;;  %v46_v9 = vshrl.u32 %v45_v8, 7 }
   0x3   :  { %300 = vmatpush3.bf16.msra.mxu0 %v321_v1  ;;  %308 = vmatpush3.bf16.msra.mxu1 %v324_v3  ;;  %v326_v6 = vld [vmem:[%s437_s3 + $0x8] sm:$0xff]   ;;  %v327_v7 = vld [vmem:[%s437_s3] sm:$0xff]  }
   0x4   :  { %301 = vmatprep.subr.bf16.mxu0 %v332_v0  ;;  %309 = vmatprep.subr.bf16.mxu1 %v332_v0  ;;  %v43_v10 = vld [vmem:[%s439_s2] sm:$0x1]  ;;  %v406_v12 = vsub.s32 0, %v46_v9 }
   0x5   :  { %v44_v11 = vunpack.c.l.bf16 %v43_v10  ;;  %v202_v25 = vld [vmem:[%s440_s4] sm:$0x1] }
   0x6   :  { %v203_v29 = vunpack.c.l.bf16 %v202_v25  ;;  %v288_v33 = vld [vmem:[%s441_s5] sm:$0xff]  }
   0x7   :  { %302 = vmatpush3.bf16.msra.mxu0 %v322_v2  ;;  %310 = vmatpush3.bf16.msra.mxu1 %v325_v5  ;;  %v48_v13 = vrot.slane %v44_v11, %v406_v12  ;;  %v289_v35 = vunpack.c.l.bf16 %v288_v33  ;;  %v290_v39 = vunpack.c.h.bf16 %v288_v33  ;;  %v243_v61 = vld [vmem:[%s442_s6] sm:$0x1] }
   0x8   :  { %311 = vmatprep.subr.bf16.mxu1 %v332_v0  ;;  %v113_v23 = vld [vmem:[#allocation2] sm:$0xff]  ;;  %v114_v28 = vld [vmem:[#allocation2 + $0x8] sm:$0xff]  ;;  %v207_v34 = vrot.slane %v203_v29, %v406_v12  ;;  %v244_v63 = vunpack.c.l.bf16 %v243_v61 }
   0x9   :  { %v251_v62 = vld [vmem:[%s443_s7] sm:$0x1] }
   0xa   :  { %304 = vmatmul.mubr.msk.bf16.vlgmr.msra.gmra.mxu0 %vm34_vm0, %v323_v4  ;;  %v248_v1 = vrot.slane %v244_v63, %v406_v12 }
   0xb   :  { %312 = vmatpush3.bf16.msra.mxu1 %v326_v6 }
   0xc   :  { %313 = vmatprep.subr.bf16.mxu1 %v332_v0  ;;  %v252_v0 = vunpack.c.l.bf16 %v251_v62 }
   0xe   :  { %v256_v3 = vrot.slane %v252_v0, %v406_v12 }
   0xf   :  { %314 = vmatpush3.bf16.msra.mxu1 %v327_v7 }
  0xca   :  { %v104_v14 = vpop.f32.mrf.mxu0 }
  0xcb   :  { %v105_v16 = vadd.f32 %v104_v14, %v48_v13 }
  0xcc   :  { %v305_v15 = vpop.f32.mrf.mxu0 }
  0xcd   :  { %v111_v20 = vmax.f32 %v105_v16, 0.0 }
  0xce   :  { %v107_v17 = vpop.f32.mrf.mxu0 }
  0xcf   :  { %v108_v18 = vadd.f32 %v107_v17, %v48_v13 }
  0xd0   :  { %v306_v19 = vpop.f32.mrf.mxu0 }
  0xd1   :  { %v112_v21 = vmax.f32 %v108_v18, 0.0 }
  0xd3   :  { %v115_v22 = vpack.c.bf16 %v112_v21, %v111_v20 }
  0xd5   :  { %316 = vmatmul.mubr.msk.bf16.vlgmr.msra.gmra.mxu1 %vm148_vm2, %v115_v22 }
 0x195   :  { %v186_v24 = vpop.f32.mrf.mxu1 }
 0x196   :  { %v193_v26 = vadd.f32 %v186_v24, %v113_v23 }
 0x197   :  { %v317_v27 = vpop.f32.mrf.mxu1 }
 0x198   :  { %195 = vst.msk [vmem:[#allocation2] sm:$0xff] %vm34_vm0, %v193_v26 }
 0x199   :  { %v189_v30 = vpop.f32.mrf.mxu1 }
 0x19a   :  { %v194_v31 = vadd.f32 %v189_v30, %v114_v28 }
 0x19b   :  { %v318_v32 = vpop.f32.mrf.mxu1 }
 0x19c   :  { %196 = vst.msk [vmem:[#allocation2 + $0x8] sm:$0xff] %vm34_vm0, %v194_v31 }
 0x19f   :  { %v200_v36 = vld [vmem:[#allocation2] sm:$0xff] }
 0x1a0   :  { %v208_v37 = vadd.f32 %v207_v34, %v200_v36 }
 0x1a2   :  { %v214_v38 = vadd.f32 %v289_v35, %v208_v37 }
 0x1a3   :  { %v201_v40 = vld [vmem:[#allocation2 + $0x8] sm:$0xff] }
 0x1a4   :  { %v216_v41 = vsel %vm34_vm0, %v214_v38, 0.0  ;;  %v209_v42 = vadd.f32 %v207_v34, %v201_v40 }
 0x1a5   :  { %217 = vadd.xlane.f32.xlu0 %v216_v41 }
 0x1a6   :  { %v215_v43 = vadd.f32 %v290_v39, %v209_v42 }
 0x1a8   :  { %v219_v44 = vsel %vm34_vm0, %v215_v43, 0.0 }
 0x1a9   :  { %220 = vadd.xlane.f32.xlu0 %v219_v44 }
 0x22e   :  { %v218_v45 = vpop.xlane.xlu0 %217 }
 0x22f   :  { %v223_v46 = vmul.f32 0.03125, %v218_v45 }
 0x231   :  { %v225_v47 = vsub.f32 %v214_v38, %v223_v46 }
 0x232   :  { %v221_v48 = vpop.xlane.xlu0 %220 }
 0x233   :  { %v224_v49 = vmul.f32 0.03125, %v221_v48  ;;  %v227_v50 = vmul.f32 %v225_v47, %v225_v47 }
 0x235   :  { %v226_v51 = vsub.f32 %v215_v43, %v224_v49  ;;  %v229_v52 = vsel %vm34_vm0, %v227_v50, 0.0 }
 0x236   :  { %230 = vadd.xlane.f32.xlu1 %v229_v52 }
 0x237   :  { %v228_v53 = vmul.f32 %v226_v51, %v226_v51 }
 0x239   :  { %v232_v54 = vsel %vm34_vm0, %v228_v53, 0.0 }
 0x23a   :  { %233 = vadd.xlane.f32.xlu1 %v232_v54 }
 0x2bf   :  { %v231_v55 = vpop.xlane.xlu1 %230 }
 0x2c0   :  { %v235_v56 = vmul.f32 0.03125, %v231_v55 }
 0x2c2   :  { %v237_v57 = vadd.f32 1e-05, %v235_v56 }
 0x2c3   :  { %v234_v58 = vpop.xlane.xlu1 %233 }
 0x2c4   :  { %328 = vrsqrt.f32 %v237_v57  ;;  %v236_v59 = vmul.f32 0.03125, %v234_v58 }
 0x2c6   :  { %v238_v60 = vadd.f32 1e-05, %v236_v59 }
 0x2c8   :  { %330 = vrsqrt.f32 %v238_v60 }
 0x2d1   :  { %v329_v2 = vpop.eup %328 }
 0x2d2   :  { %v241_v4 = vmul.f32 %v329_v2, %v225_v47 }
 0x2d4   :  { %v249_v5 = vmul.f32 %v248_v1, %v241_v4 }
 0x2d5   :  { %v331_v6 = vpop.eup %330 }
 0x2d6   :  { %v257_v7 = vadd.f32 %v256_v3, %v249_v5  ;;  %v242_v8 = vmul.f32 %v331_v6, %v226_v51 }
 0x2d8   :  { %v285_v9 = vpack.c.bf16 %v257_v7, %v257_v7  ;;  %v250_v10 = vmul.f32 %v248_v1, %v242_v8 }
 0x2da   :  { %268 = vst.msk [vmem:[%s444_s8] sm:$0xf] %vm267_vm3, %v285_v9  ;;  %v258_v11 = vadd.f32 %v256_v3, %v250_v10 }
 0x2dc   :  { %v286_v13 = vpack.c.bf16 %v258_v11, %v258_v11 }
 0x2de   :  { %269 = vst.msk [vmem:[%s444_s8 + $0x4] sm:$0xf] %vm267_vm3, %v286_v13 }

// kernel: transformer_forward.15
= control target key start
LH: loop header
LB: loop body
LE: loop exit
PB: predicated region body
PF: predicated region fallthrough
CT: control target
= control target key end

     0   :  { %v370_v1 = vmov 0.0   ;;  %vm371_vm0 = vmmov 0   ;;  %vm35_vm1 = vcmask 261120   ;;  %s474_s0 = inlined_call_operand.vmem [shape: bf16[16,32], index: 0, kind: input, shape index: {}, may-alias: {0,5}]   ;;  %s475_s1 = inlined_call_operand.vmem [shape: bf16[32,64], index: 1, kind: input, shape index: {}]   ;;  %s476_s2 = inlined_call_operand.vmem [shape: bf16[1,64], index: 2, kind: input, shape index: {}]   ;;  %s477_s3 = inlined_call_operand.vmem [shape: bf16[64,32], index: 3, kind: input, shape index: {}]   ;;  %s478_s4 = inlined_call_operand.vmem [shape: bf16[1,32], index: 4, kind: input, shape index: {}]   ;;  %s479_s5 = inlined_call_operand.vmem [shape: bf16[16,32], index: 5, kind: input, shape index: {}, may-alias: {0,5}]   ;;  %s480_s6 = inlined_call_operand.vmem [shape: bf16[1,32], index: 6, kind: input, shape index: {}]   ;;  %s481_s7 = inlined_call_operand.vmem [shape: bf16[1,32], index: 7, kind: input, shape index: {}]   ;;  %s482_s8 = inlined_call_operand.hbm [shape: bf16[16,32], index: 8, kind: output, shape index: {}]  }
   0x1   :  { %v337_v0 = vld [vmem:[%s475_s1 + $0x8] sm:$0xff]   ;;  %312 = vmatprep.subr.bf16.mxu0 %v370_v1  ;;  %320 = vmatprep.subr.bf16.mxu1 %v370_v1  ;;  %v338_v2 = vld [vmem:[%s475_s1] sm:$0xff]   ;;  %36 = vst.msk [vmem:[#allocation2] sm:$0xff] %vm35_vm1, %v370_v1  ;;  %37 = vst.msk [vmem:[#allocation2 + $0x8] sm:$0xff] %vm35_vm1, %v370_v1 }
   0x2   :  { %313 = vmatpush3.bf16.msra.mxu0 %v337_v0  ;;  %316 = vmatprep.mubr.msk.bf16.mxu0 %vm371_vm0, %v370_v1  ;;  %v340_v3 = vld [vmem:[%s477_s3 + $0x18] sm:$0xff]   ;;  %v339_v4 = vld [vmem:[%s474_s0] sm:$0xff]  }
   0x3   :  { %314 = vmatprep.subr.bf16.mxu0 %v370_v1  ;;  %328 = vmatprep.mubr.msk.bf16.mxu1 %vm371_vm0, %v370_v1 }
   0x4   :  { %321 = vmatpush3.bf16.msra.mxu1 %v340_v3 }
   0x5   :  { %322 = vmatprep.subr.bf16.mxu1 %v370_v1 }
   0x6   :  { %315 = vmatpush3.bf16.msra.mxu0 %v338_v2 }
   0x7   :  { %13 = vsyncpa [#allocation4], 0  ;;  %v341_v5 = vld [vmem:[%s477_s3 + $0x10] sm:$0xff]   ;;  %v342_v6 = vld [vmem:[%s477_s3 + $0x8] sm:$0xff]   ;;  %v46_v8 = vlaneseq  ;;  %vm149_vm2 = vcmask 523264   ;;  %vm268_vm3 = vcmask 257024  }
   0x8   :  { %323 = vmatpush3.bf16.msra.mxu1 %v341_v5  ;;  %v343_v7 = vld [vmem:[%s477_s3] sm:$0xff]   ;;  %v115_v28 = vld [vmem:[#allocation2 + $0x8] sm:$0xff] }
   0x9   :  { %317 = vmatmul.mubr.msk.bf16.vlgmr.msra.gmra.mxu0 %vm35_vm1, %v339_v4  ;;  %324 = vmatprep.subr.bf16.mxu1 %v370_v1  ;;  %v47_v9 = vshrl.u32 %v46_v8, 7  ;;  %v44_v10 = vld [vmem:[%s476_s2] sm:$0x1] }
   0xa   :  { %v45_v11 = vunpack.c.l.bf16 %v44_v10  ;;  %v114_v23 = vld [vmem:[#allocation2] sm:$0xff] }
   0xb   :  { %v447_v12 = vsub.s32 0, %v47_v9  ;;  %v203_v25 = vld [vmem:[%s478_s4] sm:$0x1] }
   0xc   :  { %325 = vmatpush3.bf16.msra.mxu1 %v342_v6  ;;  %v204_v29 = vunpack.c.l.bf16 %v203_v25  ;;  %v301_v33 = vld [vmem:[%s479_s5] sm:$0xff]  }
   0xd   :  { %326 = vmatprep.subr.bf16.mxu1 %v370_v1  ;;  %v49_v13 = vrot.slane %v45_v11, %v447_v12  ;;  %v302_v35 = vunpack.c.l.bf16 %v301_v33  ;;  %v303_v39 = vunpack.c.h.bf16 %v301_v33  ;;  %v244_v61 = vld [vmem:[%s480_s6] sm:$0x1]  ;;  %s372_s6 = smov [#allocation3]  }
   0xe   :  { %v208_v34 = vrot.slane %v204_v29, %v447_v12  ;;  %v252_v62 = vld [vmem:[%s481_s7] sm:$0x1]  ;;  %v245_v63 = vunpack.c.l.bf16 %v244_v61  ;;  %s276_s23 = sshll.u32 %s372_s6, 4  ;;  %s277_s23 = int_to_ptr.vmem [resolvable:$true] %s276_s23 }
   0xf   :  { %v253_v0 = vunpack.c.l.bf16 %v252_v62  ;;  %s348_s7 = scalar_lea.vmem %s277_s23, 128  ;;  %p353_p1 = scmp.lt.s32.totalorder %s277_s23, %s277_s23 }
  0x10   :  { %327 = vmatpush3.bf16.msra.mxu1 %v343_v7  ;;  %v249_v1 = vrot.slane %v245_v63, %v447_v12  ;;  %p349_p0 = scmp.ne.s32.totalorder %s277_s23, %s348_s7  ;;  %p354_p2 = scmp.lt.s32.totalorder %s348_s7, %s348_s7 }
  0x11   :  { %v257_v4 = vrot.slane %v253_v0, %v447_v12 }
  0x12   :  { %p355_p3 = por %p354_p2, %p353_p1 }
  0x14   :  { %p356_p4 = pnand %p355_p3, %p349_p0 }
  0xc9   :  { %v105_v14 = vpop.f32.mrf.mxu0 }
  0xca   :  { %v106_v16 = vadd.f32 %v105_v14, %v49_v13 }
  0xcb   :  { %v318_v15 = vpop.f32.mrf.mxu0 }
  0xcc   :  { %v112_v20 = vmax.f32 %v106_v16, 0.0 }
  0xcd   :  { %v108_v17 = vpop.f32.mrf.mxu0 }
  0xce   :  { %v109_v18 = vadd.f32 %v108_v17, %v49_v13 }
  0xcf   :  { %v319_v19 = vpop.f32.mrf.mxu0 }
  0xd0   :  { %v113_v21 = vmax.f32 %v109_v18, 0.0 }
  0xd2   :  { %v116_v22 = vpack.c.bf16 %v113_v21, %v112_v20 }
  0xd4   :  { %329 = vmatmul.mubr.msk.bf16.vlgmr.msra.gmra.mxu1 %vm149_vm2, %v116_v22 }
 0x194   :  { %v187_v24 = vpop.f32.mrf.mxu1 }
 0x195   :  { %v194_v26 = vadd.f32 %v187_v24, %v114_v23 }
 0x196   :  { %v330_v27 = vpop.f32.mrf.mxu1 }
 0x197   :  { %196 = vst.msk [vmem:[#allocation2] sm:$0xff] %vm35_vm1, %v194_v26 }
 0x198   :  { %v190_v30 = vpop.f32.mrf.mxu1 }
 0x199   :  { %v195_v31 = vadd.f32 %v190_v30, %v115_v28 }
 0x19a   :  { %v331_v32 = vpop.f32.mrf.mxu1 }
 0x19b   :  { %197 = vst.msk [vmem:[#allocation2 + $0x8] sm:$0xff] %vm35_vm1, %v195_v31 }
 0x19e   :  { %v201_v36 = vld [vmem:[#allocation2] sm:$0xff] }
 0x19f   :  { %v209_v37 = vadd.f32 %v208_v34, %v201_v36 }
 0x1a1   :  { %v215_v38 = vadd.f32 %v302_v35, %v209_v37 }
 0x1a2   :  { %v202_v40 = vld [vmem:[#allocation2 + $0x8] sm:$0xff] }
 0x1a3   :  { %v217_v41 = vsel %vm35_vm1, %v215_v38, 0.0  ;;  %v210_v42 = vadd.f32 %v208_v34, %v202_v40 }
 0x1a4   :  { %218 = vadd.xlane.f32.xlu0 %v217_v41 }
 0x1a5   :  { %v216_v43 = vadd.f32 %v303_v39, %v210_v42 }
 0x1a7   :  { %v220_v44 = vsel %vm35_vm1, %v216_v43, 0.0 }
 0x1a8   :  { %221 = vadd.xlane.f32.xlu0 %v220_v44 }
 0x22d   :  { %v219_v45 = vpop.xlane.xlu0 %218 }
 0x22e   :  { %v224_v46 = vmul.f32 0.03125, %v219_v45 }
 0x230   :  { %v226_v47 = vsub.f32 %v215_v38, %v224_v46 }
 0x231   :  { %v222_v48 = vpop.xlane.xlu0 %221 }
 0x232   :  { %v225_v49 = vmul.f32 0.03125, %v222_v48  ;;  %v228_v50 = vmul.f32 %v226_v47, %v226_v47 }
 0x234   :  { %v227_v51 = vsub.f32 %v216_v43, %v225_v49  ;;  %v230_v52 = vsel %vm35_vm1, %v228_v50, 0.0 }
 0x235   :  { %231 = vadd.xlane.f32.xlu1 %v230_v52 }
 0x236   :  { %v229_v53 = vmul.f32 %v227_v51, %v227_v51 }
 0x238   :  { %v233_v54 = vsel %vm35_vm1, %v229_v53, 0.0 }
 0x239   :  { %234 = vadd.xlane.f32.xlu1 %v233_v54 }
 0x2be   :  { %v232_v55 = vpop.xlane.xlu1 %231 }
 0x2bf   :  { %v236_v56 = vmul.f32 0.03125, %v232_v55 }
 0x2c1   :  { %v238_v57 = vadd.f32 1e-05, %v236_v56 }
 0x2c2   :  { %v235_v58 = vpop.xlane.xlu1 %234 }
 0x2c3   :  { %344 = vrsqrt.f32 %v238_v57  ;;  %v237_v59 = vmul.f32 0.03125, %v235_v58 }
 0x2c5   :  { %v239_v60 = vadd.f32 1e-05, %v237_v59 }
 0x2c7   :  { %346 = vrsqrt.f32 %v239_v60 }
 0x2d0   :  { %v345_v2 = vpop.eup %344 }
 0x2d1   :  { %v242_v3 = vmul.f32 %v345_v2, %v226_v47 }
 0x2d3   :  { %v250_v5 = vmul.f32 %v249_v1, %v242_v3 }
 0x2d4   :  { %v347_v6 = vpop.eup %346 }
 0x2d5   :  { %v243_v7 = vmul.f32 %v347_v6, %v227_v51  ;;  %v258_v8 = vadd.f32 %v257_v4, %v250_v5 }
 0x2d7   :  { %v251_v9 = vmul.f32 %v249_v1, %v243_v7  ;;  %v298_v10 = vpack.c.bf16 %v258_v8, %v258_v8 }
 0x2d9   :  { %v259_v11 = vadd.f32 %v257_v4, %v251_v9  ;;  %269 = vst.msk [vmem:[#allocation3] sm:$0xf] %vm268_vm3, %v298_v10 }
 0x2db   :  { %v299_v13 = vpack.c.bf16 %v259_v11, %v259_v11 }
 0x2dd   :  { %270 = vst.msk [vmem:[#allocation3 + $0x4] sm:$0xf] %vm268_vm3, %v299_v13 }
 0x2de   :  { %359 = shalt.err (!%p356_p4)
}
 0x2df   :  { %s373_s24 = smov 64   ;;  %s374_s25 = smov 4  }
 0x2e0   :  { %282 = dma.vmem_to_hbm [thread:$0]  %s277_s23, 128, %s482_s8, [#allocation4], %s373_s24, %s373_s24, %s374_s25  }
 0x2e1   :  { %368 = dma.done.wait [#allocation4], 128  }
 0x2e2   :  { %369 = vsyncadd [#allocation4], 4294967168 }
 0x2e3   :  { %286 = vsyncpa [#allocation4], 1 }

</bundles_post_ra>
